<compile_context>
chip_gen: v5e
topology: v5e:2x2
jax: 0.10.0
libtpu: 0.0.40
codegen_flags: <defaults>
</compile_context>

<pallas_src>
import functools

import jax
import jax.numpy as jnp
import numpy as np
from jax.experimental import pallas as pl
from jax.experimental.pallas import tpu as pltpu

_PAD = 128  # lane padding on each side of the flattened spatial axis (>= W+1)


def _swish(y):
    return y * (1.0 / (1.0 + jnp.exp(-y)))


# ----------------------------- fused kernel ---------------------------------
def _fused_kernel(H, W,
                  x_ref, w1_ref, b1_ref, k_ref, b2_ref, w2_ref, b3_ref,
                  o_ref, hpad_ref):
    HW = H * W
    Cdw = hpad_ref.shape[0]

    x = x_ref[0]                                              # (Cin, HW) f32

    # ---- 1x1 expand conv (bf16 MXU, f32 acc) + folded BN + Swish ----------
    h = jnp.dot(w1_ref[...], x.astype(jnp.bfloat16),
                preferred_element_type=jnp.float32)           # (Cdw, HW)
    h = _swish(h + b1_ref[...])

    # ---- depthwise 3x3 (stride 1, pad 1) on the flattened spatial axis ----
    # Zero-padded VMEM scratch: hpad[:, _PAD + p] = h[:, p], zeros elsewhere.
    hpad_ref[...] = jnp.zeros_like(hpad_ref)
    hpad_ref[:, _PAD:_PAD + HW] = h

    col = jax.lax.broadcasted_iota(jnp.int32, (Cdw, HW), 1) % W
    not_left = (col >= 1).astype(jnp.float32)        # valid when ox == -1
    not_right = (col <= W - 2).astype(jnp.float32)   # valid when ox == +1

    k = k_ref[...]                                   # (Cdw, 9), bn2 folded
    acc = jnp.zeros((Cdw, HW), jnp.float32)
    for oy in (-1, 0, 1):
        for ox in (-1, 0, 1):
            start = _PAD + oy * W + ox
            tap = hpad_ref[:, start:start + HW]      # (Cdw, HW) shifted load
            if ox == -1:
                tap = tap * not_left
            elif ox == 1:
                tap = tap * not_right
            t = (oy + 1) * 3 + (ox + 1)
            acc = acc + tap * k[:, t:t + 1]
    d = _swish(acc + b2_ref[...])                    # (Cdw, HW) f32

    # ---- 1x1 project + fused residual 1x1: single MXU pass, K = Cdw+Cin ----
    cat = jnp.concatenate([d, x], axis=0).astype(jnp.bfloat16)   # (Cdw+Cin, HW)
    y = jnp.dot(w2_ref[...], cat, preferred_element_type=jnp.float32)
    o_ref[0] = y + b3_ref[...]                       # (Cout, HW), lane-dense


# --------------------------- Python wrapper ---------------------------------
def inverted_residual_forward(x_nchw, params, *, stride=1, identity=True,
                              no_expand=False):
    assert stride == 1, "TODO(synk): stride=2 depthwise not implemented"
    assert not no_expand, "TODO(synk): no_expand path not implemented"
    del identity  # encoded in params["w2cat"] (wres columns zero if no residual)

    N, Cin, H, W = x_nchw.shape
    HW = H * W
    x = x_nchw.astype(jnp.float32).reshape(N, Cin, HW)   # NCHW -> (N, C, HW), free

    w1 = params["w1f"]       # (Cdw, Cin)        bf16, bn1 scale folded
    b1 = params["b1"]        # (Cdw, 1)          f32
    kdw = params["kdwf"]     # (Cdw, 9)          f32, bn2 scale folded
    b2 = params["b2"]        # (Cdw, 1)          f32
    w2c = params["w2cat"]    # (Cout, Cdw+Cin)   bf16 : [bn3*w2 | wres]
    b3 = params["b3"]        # (Cout, 1)         f32
    Cdw = w1.shape[0]
    Cout = w2c.shape[0]

    kernel = functools.partial(_fused_kernel, H, W)
    out = pl.pallas_call(
        kernel,
        out_shape=jax.ShapeDtypeStruct((N, Cout, HW), jnp.float32),
        grid=(N,),
        in_specs=[
            pl.BlockSpec((1, Cin, HW), lambda n: (n, 0, 0)),
            pl.BlockSpec((Cdw, Cin), lambda n: (0, 0)),
            pl.BlockSpec((Cdw, 1), lambda n: (0, 0)),
            pl.BlockSpec((Cdw, 9), lambda n: (0, 0)),
            pl.BlockSpec((Cdw, 1), lambda n: (0, 0)),
            pl.BlockSpec((Cout, Cdw + Cin), lambda n: (0, 0)),
            pl.BlockSpec((Cout, 1), lambda n: (0, 0)),
        ],
        out_specs=pl.BlockSpec((1, Cout, HW), lambda n: (n, 0, 0)),
        scratch_shapes=[pltpu.VMEM((Cdw, HW + 2 * _PAD), jnp.float32)],
        compiler_params=pltpu.CompilerParams(
            dimension_semantics=("parallel",)),
    )(x, w1, b1, kdw, b2, w2c, b3)

    return out.reshape(N, Cout, H, W)                # back to NCHW, free reshape


# ------------------------- parameter construction ---------------------------
def make_params(key, Cin, Cdw, Cout, identity=True):
    ks = jax.random.split(key, 8)

    def bn_fold(k, C):
        k1, k2, k3, k4 = jax.random.split(k, 4)
        gamma = 1.0 + 0.1 * jax.random.normal(k1, (C,), jnp.float32)
        beta = 0.1 * jax.random.normal(k2, (C,), jnp.float32)
        mean = 0.1 * jax.random.normal(k3, (C,), jnp.float32)
        var = jax.random.uniform(k4, (C,), jnp.float32, 0.5, 1.5)
        scale = gamma / jnp.sqrt(var + 1e-5)
        bias = beta - mean * scale
        return scale, bias

    # torch-layout weights
    w1_t = 0.1 * jax.random.normal(ks[0], (Cdw, Cin), jnp.float32)       # 1x1 (O,I)
    kdw_t = 0.1 * jax.random.normal(ks[1], (Cdw, 1, 3, 3), jnp.float32)  # depthwise
    w2_t = 0.1 * jax.random.normal(ks[2], (Cout, Cdw), jnp.float32)
    wres_t = 0.1 * jax.random.normal(ks[3], (Cout, Cin), jnp.float32)
    if not identity:
        wres_t = jnp.zeros_like(wres_t)
    s1, b1 = bn_fold(ks[4], Cdw)
    s2, b2 = bn_fold(ks[5], Cdw)
    s3, b3 = bn_fold(ks[6], Cout)

    params = {
        # BN scales folded into the conv weights; kernel only adds biases.
        "w1f": (s1[:, None] * w1_t).astype(jnp.bfloat16),          # (Cdw, Cin)
        "b1": b1.reshape(Cdw, 1),
        "kdwf": s2[:, None] * kdw_t.reshape(Cdw, 9),               # (Cdw, 9) f32
        "b2": b2.reshape(Cdw, 1),
        "w2cat": jnp.concatenate([s3[:, None] * w2_t, wres_t],
                                 axis=1).astype(jnp.bfloat16),     # (Cout, Cdw+Cin)
        "b3": b3.reshape(Cout, 1),
    }
    torch_layout = dict(w1=w1_t, kdw=kdw_t, w2=w2_t, wres=wres_t,
                        s1=s1, b1=b1, s2=s2, b2=b2, s3=s3, b3=b3)
    return params, torch_layout


# ------------------------- pure-JAX reference (NCHW, f32) -------------------
def ref_forward(x, tp, Cdw):
    dn = ("NCHW", "OIHW", "NCHW")

    def conv1x1(h, w):
        return jax.lax.conv_general_dilated(h, w[:, :, None, None], (1, 1),
                                            "VALID", dimension_numbers=dn)

    def bn(h, s, b):
        return h * s.reshape(1, -1, 1, 1) + b.reshape(1, -1, 1, 1)

    def swish(h):
        return h * jax.nn.sigmoid(h)

    h = swish(bn(conv1x1(x, tp["w1"]), tp["s1"], tp["b1"]))
    h = jax.lax.conv_general_dilated(h, tp["kdw"], (1, 1), ((1, 1), (1, 1)),
                                     dimension_numbers=dn,
                                     feature_group_count=Cdw)
    h = swish(bn(h, tp["s2"], tp["b2"]))
    h = bn(conv1x1(h, tp["w2"]), tp["s3"], tp["b3"])
    return h + conv1x1(x, tp["wres"])


if __name__ == "__main__":
    N, Cin, H, W = 2, 8, 16, 16
    Cdw, Cout = 32, 8          # identity residual: stride=1, spatial preserved

    key = jax.random.PRNGKey(0)
    kx, kp = jax.random.split(key)
    x = jax.random.normal(kx, (N, Cin, H, W), jnp.float32)
    params, torch_layout = make_params(kp, Cin, Cdw, Cout, identity=True)

    out = inverted_residual_forward(x, params, stride=1, identity=True,
                                    no_expand=False)
    out = jax.block_until_ready(out)

    ref = ref_forward(x, torch_layout, Cdw)
    assert out.shape == (N, Cout, H, W), out.shape
    # bf16 MXU (f32 accumulation) vs. pure-f32 reference => looser tolerance.
    np.testing.assert_allclose(np.asarray(out), np.asarray(ref),
                               rtol=3e-2, atol=3e-2)
    print("KERNEL_OK")
</pallas_src>

<mosaic_0001>
module attributes {stable_mosaic.version = 11 : i64} {
  func.func @_fused_kernel(%arg0: i32, %arg1: memref<1x8x256xf32, #tpu.memory_space<vmem>>, %arg2: memref<32x8xbf16, #tpu.memory_space<vmem>>, %arg3: memref<32x1xf32, #tpu.memory_space<vmem>>, %arg4: memref<32x9xf32, #tpu.memory_space<vmem>>, %arg5: memref<32x1xf32, #tpu.memory_space<vmem>>, %arg6: memref<8x40xbf16, #tpu.memory_space<vmem>>, %arg7: memref<8x1xf32, #tpu.memory_space<vmem>>, %arg8: memref<1x8x256xf32, #tpu.memory_space<vmem>>, %arg9: memref<32x512xf32, #tpu.memory_space<vmem>>) attributes {dimension_semantics = [#tpu.dimension_semantics<parallel>], iteration_bounds = array<i64: 2>, scalar_prefetch = 0 : i64, scratch_operands = 1 : i64, tpu.core_type = #tpu.core_type<tc>, window_params = [{transform_indices = @transform_0, window_bounds = array<i64: 1, 8, 256>}, {pipeline_mode = #tpu.pipeline_mode<synchronous>, transform_indices = @transform_1, window_bounds = array<i64: 32, 8>}, {pipeline_mode = #tpu.pipeline_mode<synchronous>, transform_indices = @transform_2, window_bounds = array<i64: 32, 1>}, {pipeline_mode = #tpu.pipeline_mode<synchronous>, transform_indices = @transform_3, window_bounds = array<i64: 32, 9>}, {pipeline_mode = #tpu.pipeline_mode<synchronous>, transform_indices = @transform_4, window_bounds = array<i64: 32, 1>}, {pipeline_mode = #tpu.pipeline_mode<synchronous>, transform_indices = @transform_5, window_bounds = array<i64: 8, 40>}, {pipeline_mode = #tpu.pipeline_mode<synchronous>, transform_indices = @transform_6, window_bounds = array<i64: 8, 1>}, {transform_indices = @transform_7, window_bounds = array<i64: 1, 8, 256>}]} {
    %c0 = arith.constant 0 : index
    %c0_0 = arith.constant 0 : index
    %c0_1 = arith.constant 0 : index
    %0 = vector.load %arg1[%c0, %c0_0, %c0_1] : memref<1x8x256xf32, #tpu.memory_space<vmem>>, vector<1x8x256xf32>
    %1 = vector.shape_cast %0 : vector<1x8x256xf32> to vector<8x256xf32>
    %c0_2 = arith.constant 0 : index
    %c0_3 = arith.constant 0 : index
    %2 = vector.load %arg2[%c0_2, %c0_3] : memref<32x8xbf16, #tpu.memory_space<vmem>>, vector<32x8xbf16>
    %3 = arith.truncf %1 : vector<8x256xf32> to vector<8x256xbf16>
    %cst = arith.constant dense<0.000000e+00> : vector<32x256xf32>
    %4 = tpu.matmul %2, %3, %cst {dimension_numbers = #tpu.dot_dimension_numbers<[1], [0], [0], [1], [0, 0, 1, 1], [], []>} : vector<32x8xbf16>, vector<8x256xbf16>, vector<32x256xf32> -> vector<32x256xf32>
    %c0_4 = arith.constant 0 : index
    %c0_5 = arith.constant 0 : index
    %5 = vector.load %arg3[%c0_4, %c0_5] : memref<32x1xf32, #tpu.memory_space<vmem>>, vector<32x1xf32>
    %6 = vector.broadcast %5 : vector<32x1xf32> to vector<32x256xf32>
    %7 = arith.addf %4, %6 : vector<32x256xf32>
    %cst_6 = arith.constant 0.000000e+00 : f32
    %8 = vector.broadcast %cst_6 : f32 to vector<32x256xf32>
    %9 = arith.subf %8, %7 : vector<32x256xf32>
    %10 = math.exp %9 : vector<32x256xf32>
    %cst_7 = arith.constant 1.000000e+00 : f32
    %11 = vector.broadcast %cst_7 : f32 to vector<32x256xf32>
    %12 = arith.addf %11, %10 : vector<32x256xf32>
    %cst_8 = arith.constant 1.000000e+00 : f32
    %13 = vector.broadcast %cst_8 : f32 to vector<32x256xf32>
    %14 = arith.divf %13, %12 : vector<32x256xf32>
    %15 = arith.mulf %7, %14 : vector<32x256xf32>
    %cst_9 = arith.constant 0.000000e+00 : f32
    %16 = vector.broadcast %cst_9 : f32 to vector<32x512xf32>
    %c0_10 = arith.constant 0 : index
    %c0_11 = arith.constant 0 : index
    %17 = vector.load %arg9[%c0_10, %c0_11] : memref<32x512xf32, #tpu.memory_space<vmem>>, vector<32x512xf32>
    tpu.vector_store %arg9[%c0_10, %c0_11], %16 {strides = array<i32>} : memref<32x512xf32, #tpu.memory_space<vmem>>, vector<32x512xf32>,
    %c0_12 = arith.constant 0 : index
    %c128 = arith.constant 128 : index
    %18 = vector.load %arg9[%c0_12, %c128] : memref<32x512xf32, #tpu.memory_space<vmem>>, vector<32x256xf32>
    tpu.vector_store %arg9[%c0_12, %c128], %15 {strides = array<i32>} : memref<32x512xf32, #tpu.memory_space<vmem>>, vector<32x256xf32>,
    %19 = tpu.iota {dimensions = array<i32: 1>} : vector<32x256xi32>
    %c16_i32 = arith.constant 16 : i32
    %c0_i32 = arith.constant 0 : i32
    %20 = arith.cmpi eq, %c16_i32, %c0_i32 : i32
    %c1_i32 = arith.constant 1 : i32
    %21 = arith.select %20, %c1_i32, %c16_i32 : i32
    %22 = vector.broadcast %21 : i32 to vector<32x256xi32>
    %23 = arith.remsi %19, %22 : vector<32x256xi32>
    %c0_i32_13 = arith.constant 0 : i32
    %24 = vector.broadcast %c0_i32_13 : i32 to vector<32x256xi32>
    %25 = arith.cmpi ne, %23, %24 : vector<32x256xi32>
    %c0_i32_14 = arith.constant 0 : i32
    %26 = vector.broadcast %c0_i32_14 : i32 to vector<32x256xi32>
    %27 = arith.cmpi slt, %23, %26 : vector<32x256xi32>
    %c0_i32_15 = arith.constant 0 : i32
    %28 = arith.cmpi slt, %21, %c0_i32_15 : i32
    %29 = vector.broadcast %28 : i1 to vector<32x256xi1>
    %30 = vector.broadcast %29 : vector<32x256xi1> to vector<32x256xi1>
    %31 = arith.xori %27, %30 : vector<32x256xi1>
    %32 = arith.andi %31, %25 : vector<32x256xi1>
    %33 = vector.broadcast %21 : i32 to vector<32x256xi32>
    %34 = arith.addi %23, %33 : vector<32x256xi32>
    %35 = arith.select %32, %34, %23 : vector<32x256xi1>, vector<32x256xi32>
    %c1_i32_16 = arith.constant 1 : i32
    %36 = vector.broadcast %c1_i32_16 : i32 to vector<32x256xi32>
    %37 = arith.cmpi sge, %35, %36 : vector<32x256xi32>
    %38 = arith.extui %37 : vector<32x256xi1> to vector<32x256xi32>
    %39 = arith.sitofp %38 : vector<32x256xi32> to vector<32x256xf32>
    %c14_i32 = arith.constant 14 : i32
    %40 = vector.broadcast %c14_i32 : i32 to vector<32x256xi32>
    %41 = arith.cmpi sle, %35, %40 : vector<32x256xi32>
    %42 = arith.extui %41 : vector<32x256xi1> to vector<32x256xi32>
    %43 = arith.sitofp %42 : vector<32x256xi32> to vector<32x256xf32>
    %c0_17 = arith.constant 0 : index
    %c0_18 = arith.constant 0 : index
    %44 = vector.load %arg4[%c0_17, %c0_18] : memref<32x9xf32, #tpu.memory_space<vmem>>, vector<32x9xf32>
    %cst_19 = arith.constant 0.000000e+00 : f32
    %45 = vector.broadcast %cst_19 : f32 to vector<32x256xf32>
    %c0_20 = arith.constant 0 : index
    %c111 = arith.constant 111 : index
    %46 = vector.load %arg9[%c0_20, %c111] : memref<32x512xf32, #tpu.memory_space<vmem>>, vector<32x256xf32>
    %47 = arith.mulf %46, %39 : vector<32x256xf32>
    %48 = vector.extract_strided_slice %44 {offsets = [0, 0], sizes = [32, 1], strides = [1, 1]} : vector<32x9xf32> to vector<32x1xf32>
    %49 = vector.broadcast %48 : vector<32x1xf32> to vector<32x256xf32>
    %50 = arith.mulf %47, %49 : vector<32x256xf32>
    %51 = arith.addf %45, %50 : vector<32x256xf32>
    %c0_21 = arith.constant 0 : index
    %c112 = arith.constant 112 : index
    %52 = vector.load %arg9[%c0_21, %c112] : memref<32x512xf32, #tpu.memory_space<vmem>>, vector<32x256xf32>
    %53 = vector.extract_strided_slice %44 {offsets = [0, 1], sizes = [32, 1], strides = [1, 1]} : vector<32x9xf32> to vector<32x1xf32>
    %54 = vector.broadcast %53 : vector<32x1xf32> to vector<32x256xf32>
    %55 = arith.mulf %52, %54 : vector<32x256xf32>
    %56 = arith.addf %51, %55 : vector<32x256xf32>
    %c0_22 = arith.constant 0 : index
    %c113 = arith.constant 113 : index
    %57 = vector.load %arg9[%c0_22, %c113] : memref<32x512xf32, #tpu.memory_space<vmem>>, vector<32x256xf32>
    %58 = arith.mulf %57, %43 : vector<32x256xf32>
    %59 = vector.extract_strided_slice %44 {offsets = [0, 2], sizes = [32, 1], strides = [1, 1]} : vector<32x9xf32> to vector<32x1xf32>
    %60 = vector.broadcast %59 : vector<32x1xf32> to vector<32x256xf32>
    %61 = arith.mulf %58, %60 : vector<32x256xf32>
    %62 = arith.addf %56, %61 : vector<32x256xf32>
    %c0_23 = arith.constant 0 : index
    %c127 = arith.constant 127 : index
    %63 = vector.load %arg9[%c0_23, %c127] : memref<32x512xf32, #tpu.memory_space<vmem>>, vector<32x256xf32>
    %64 = arith.mulf %63, %39 : vector<32x256xf32>
    %65 = vector.extract_strided_slice %44 {offsets = [0, 3], sizes = [32, 1], strides = [1, 1]} : vector<32x9xf32> to vector<32x1xf32>
    %66 = vector.broadcast %65 : vector<32x1xf32> to vector<32x256xf32>
    %67 = arith.mulf %64, %66 : vector<32x256xf32>
    %68 = arith.addf %62, %67 : vector<32x256xf32>
    %c0_24 = arith.constant 0 : index
    %c128_25 = arith.constant 128 : index
    %69 = vector.load %arg9[%c0_24, %c128_25] : memref<32x512xf32, #tpu.memory_space<vmem>>, vector<32x256xf32>
    %70 = vector.extract_strided_slice %44 {offsets = [0, 4], sizes = [32, 1], strides = [1, 1]} : vector<32x9xf32> to vector<32x1xf32>
    %71 = vector.broadcast %70 : vector<32x1xf32> to vector<32x256xf32>
    %72 = arith.mulf %69, %71 : vector<32x256xf32>
    %73 = arith.addf %68, %72 : vector<32x256xf32>
    %c0_26 = arith.constant 0 : index
    %c129 = arith.constant 129 : index
    %74 = vector.load %arg9[%c0_26, %c129] : memref<32x512xf32, #tpu.memory_space<vmem>>, vector<32x256xf32>
    %75 = arith.mulf %74, %43 : vector<32x256xf32>
    %76 = vector.extract_strided_slice %44 {offsets = [0, 5], sizes = [32, 1], strides = [1, 1]} : vector<32x9xf32> to vector<32x1xf32>
    %77 = vector.broadcast %76 : vector<32x1xf32> to vector<32x256xf32>
    %78 = arith.mulf %75, %77 : vector<32x256xf32>
    %79 = arith.addf %73, %78 : vector<32x256xf32>
    %c0_27 = arith.constant 0 : index
    %c143 = arith.constant 143 : index
    %80 = vector.load %arg9[%c0_27, %c143] : memref<32x512xf32, #tpu.memory_space<vmem>>, vector<32x256xf32>
    %81 = arith.mulf %80, %39 : vector<32x256xf32>
    %82 = vector.extract_strided_slice %44 {offsets = [0, 6], sizes = [32, 1], strides = [1, 1]} : vector<32x9xf32> to vector<32x1xf32>
    %83 = vector.broadcast %82 : vector<32x1xf32> to vector<32x256xf32>
    %84 = arith.mulf %81, %83 : vector<32x256xf32>
    %85 = arith.addf %79, %84 : vector<32x256xf32>
    %c0_28 = arith.constant 0 : index
    %c144 = arith.constant 144 : index
    %86 = vector.load %arg9[%c0_28, %c144] : memref<32x512xf32, #tpu.memory_space<vmem>>, vector<32x256xf32>
    %87 = vector.extract_strided_slice %44 {offsets = [0, 7], sizes = [32, 1], strides = [1, 1]} : vector<32x9xf32> to vector<32x1xf32>
    %88 = vector.broadcast %87 : vector<32x1xf32> to vector<32x256xf32>
    %89 = arith.mulf %86, %88 : vector<32x256xf32>
    %90 = arith.addf %85, %89 : vector<32x256xf32>
    %c0_29 = arith.constant 0 : index
    %c145 = arith.constant 145 : index
    %91 = vector.load %arg9[%c0_29, %c145] : memref<32x512xf32, #tpu.memory_space<vmem>>, vector<32x256xf32>
    %92 = arith.mulf %91, %43 : vector<32x256xf32>
    %93 = vector.extract_strided_slice %44 {offsets = [0, 8], sizes = [32, 1], strides = [1, 1]} : vector<32x9xf32> to vector<32x1xf32>
    %94 = vector.broadcast %93 : vector<32x1xf32> to vector<32x256xf32>
    %95 = arith.mulf %92, %94 : vector<32x256xf32>
    %96 = arith.addf %90, %95 : vector<32x256xf32>
    %c0_30 = arith.constant 0 : index
    %c0_31 = arith.constant 0 : index
    %97 = vector.load %arg5[%c0_30, %c0_31] : memref<32x1xf32, #tpu.memory_space<vmem>>, vector<32x1xf32>
    %98 = vector.broadcast %97 : vector<32x1xf32> to vector<32x256xf32>
    %99 = arith.addf %96, %98 : vector<32x256xf32>
    %cst_32 = arith.constant 0.000000e+00 : f32
    %100 = vector.broadcast %cst_32 : f32 to vector<32x256xf32>
    %101 = arith.subf %100, %99 : vector<32x256xf32>
    %102 = math.exp %101 : vector<32x256xf32>
    %cst_33 = arith.constant 1.000000e+00 : f32
    %103 = vector.broadcast %cst_33 : f32 to vector<32x256xf32>
    %104 = arith.addf %103, %102 : vector<32x256xf32>
    %cst_34 = arith.constant 1.000000e+00 : f32
    %105 = vector.broadcast %cst_34 : f32 to vector<32x256xf32>
    %106 = arith.divf %105, %104 : vector<32x256xf32>
    %107 = arith.mulf %99, %106 : vector<32x256xf32>
    %108 = tpu.concatenate %107, %1 in 0 : vector<32x256xf32>, vector<8x256xf32> -> vector<40x256xf32>
    %109 = arith.truncf %108 : vector<40x256xf32> to vector<40x256xbf16>
    %c0_35 = arith.constant 0 : index
    %c0_36 = arith.constant 0 : index
    %110 = vector.load %arg6[%c0_35, %c0_36] : memref<8x40xbf16, #tpu.memory_space<vmem>>, vector<8x40xbf16>
    %cst_37 = arith.constant dense<0.000000e+00> : vector<8x256xf32>
    %111 = tpu.matmul %110, %109, %cst_37 {dimension_numbers = #tpu.dot_dimension_numbers<[1], [0], [0], [1], [0, 0, 1, 1], [], []>} : vector<8x40xbf16>, vector<40x256xbf16>, vector<8x256xf32> -> vector<8x256xf32>
    %c0_38 = arith.constant 0 : index
    %c0_39 = arith.constant 0 : index
    %112 = vector.load %arg7[%c0_38, %c0_39] : memref<8x1xf32, #tpu.memory_space<vmem>>, vector<8x1xf32>
    %113 = vector.broadcast %112 : vector<8x1xf32> to vector<8x256xf32>
    %114 = arith.addf %111, %113 : vector<8x256xf32>
    %c0_40 = arith.constant 0 : index
    %c0_41 = arith.constant 0 : index
    %c0_42 = arith.constant 0 : index
    %115 = vector.load %arg8[%c0_40, %c0_41, %c0_42] : memref<1x8x256xf32, #tpu.memory_space<vmem>>, vector<1x8x256xf32>
    %116 = vector.shape_cast %115 : vector<1x8x256xf32> to vector<8x256xf32>
    %117 = vector.shape_cast %114 : vector<8x256xf32> to vector<1x8x256xf32>
    tpu.vector_store %arg8[%c0_40, %c0_41, %c0_42], %117 {strides = array<i32>} : memref<1x8x256xf32, #tpu.memory_space<vmem>>, vector<1x8x256xf32>,
    return
  }
  func.func @transform_0(%arg0: i32) -> (i32, i32, i32) {
    %c0_i32 = arith.constant 0 : i32
    %c0_i32_0 = arith.constant 0 : i32
    %c0_i32_1 = arith.constant 0 : i32
    return %arg0, %c0_i32, %c0_i32_0 : i32, i32, i32
  }
  func.func @transform_1(%arg0: i32) -> (i32, i32) {
    %c0_i32 = arith.constant 0 : i32
    %c0_i32_0 = arith.constant 0 : i32
    %c0_i32_1 = arith.constant 0 : i32
    return %c0_i32, %c0_i32_0 : i32, i32
  }
  func.func @transform_2(%arg0: i32) -> (i32, i32) {
    %c0_i32 = arith.constant 0 : i32
    %c0_i32_0 = arith.constant 0 : i32
    %c0_i32_1 = arith.constant 0 : i32
    return %c0_i32, %c0_i32_0 : i32, i32
  }
  func.func @transform_3(%arg0: i32) -> (i32, i32) {
    %c0_i32 = arith.constant 0 : i32
    %c0_i32_0 = arith.constant 0 : i32
    %c0_i32_1 = arith.constant 0 : i32
    return %c0_i32, %c0_i32_0 : i32, i32
  }
  func.func @transform_4(%arg0: i32) -> (i32, i32) {
    %c0_i32 = arith.constant 0 : i32
    %c0_i32_0 = arith.constant 0 : i32
    %c0_i32_1 = arith.constant 0 : i32
    return %c0_i32, %c0_i32_0 : i32, i32
  }
  func.func @transform_5(%arg0: i32) -> (i32, i32) {
    %c0_i32 = arith.constant 0 : i32
    %c0_i32_0 = arith.constant 0 : i32
    %c0_i32_1 = arith.constant 0 : i32
    return %c0_i32, %c0_i32_0 : i32, i32
  }
  func.func @transform_6(%arg0: i32) -> (i32, i32) {
    %c0_i32 = arith.constant 0 : i32
    %c0_i32_0 = arith.constant 0 : i32
    %c0_i32_1 = arith.constant 0 : i32
    return %c0_i32, %c0_i32_0 : i32, i32
  }
  func.func @transform_7(%arg0: i32) -> (i32, i32, i32) {
    %c0_i32 = arith.constant 0 : i32
    %c0_i32_0 = arith.constant 0 : i32
    %c0_i32_1 = arith.constant 0 : i32
    return %arg0, %c0_i32, %c0_i32_0 : i32, i32, i32
  }
}

</mosaic_0001>

<bundles_post_ra>
// kernel: tpu_custom_call.1
= control target key start
LH: loop header
LB: loop body
LE: loop exit
PB: predicated region body
PF: predicated region fallthrough
CT: control target
= control target key end

     0   :  { %12 = vsyncpa [#allocation4], 0  ;;  %s3787_s0 = inlined_call_operand.vmem [shape: f32[2,8,256], index: 0, kind: input, shape index: {}]   ;;  %s3788_s1 = inlined_call_operand.vmem [shape: bf16[32,8], index: 1, kind: input, shape index: {}]   ;;  %s3789_s2 = inlined_call_operand.vmem [shape: f32[32,1], index: 2, kind: input, shape index: {}]   ;;  %s3790_s3 = inlined_call_operand.vmem [shape: f32[32,9], index: 3, kind: input, shape index: {}]   ;;  %s3791_s4 = inlined_call_operand.vmem [shape: f32[32,1], index: 4, kind: input, shape index: {}]   ;;  %s3792_s5 = inlined_call_operand.vmem [shape: bf16[8,40], index: 5, kind: input, shape index: {}]   ;;  %s3793_s6 = inlined_call_operand.vmem [shape: f32[8,1], index: 6, kind: input, shape index: {}]   ;;  %s3794_s7 = inlined_call_operand.hbm [shape: f32[2,8,256], index: 7, kind: output, shape index: {}]  }
   0x1   :  { %14 = vsyncpa [#allocation4 + $0x1], 0  ;;  %s2373_s24 = smov 0   ;;  %s2375_s25 = smov 0  }
   0x2   :  { %s2377_s26 = smov 0   ;;  %s2379_s27 = smov 0  }
   0x3 LB: > { %s2394_s28 = sadd.s32 4294967295, %s2309_s27   ;;  %s2005_s29 = sadd.s32 4294967294, %s2309_s27   ;;  %s2309_s27 = sphi %s2379_s27, %s3862_s27   ;;  %s2305_s26 = sphi %s2377_s26, %s3861_s26   ;;  %s2301_s25 = sphi %s2375_s25, %s3860_s25   ;;  %s2297_s24 = sphi %s2373_s24, %s3859_s24  }
   0x4   : > { %s2398_s30 = sadd.s32 1, %s2309_s27   ;;  %s179_s8 = sadd.s32 1, %s2305_s26 }
   0x5   : > { %s176_s9 = ssub.s32 %s2309_s27, %s2398_s30  ;;  %p189_p0 = scmp.ne.s32.totalorder %s2305_s26, %s2301_s25 }
   0x6   : > { %p177_p1 = scmp.eq.s32.totalorder %s176_s9, 0  ;;  %p190_p2 = scmp.eq.s32.totalorder %s2394_s28, 1 }
   0x7   : > { %p195_p3 = scmp.ne.s32.totalorder %s2301_s25, %s2297_s24  ;;  %p196_p4 = scmp.eq.s32.totalorder %s2005_s29, 1 }
   0x8   : > { %s2409_s10 = scalar_select %p177_p1, %s2305_s26, %s179_s8  }
   0x9   : > { %p2411_p5 = por %p190_p2, %p189_p0  ;;  %p2415_p6 = por %p196_p4, %p195_p3 }
   0xa   : > { %p2008_p7 = scmp.ge.s32.totalorder %s2309_s27, 1  ;;  %p240_p8 = scmp.lt.s32.totalorder %s2309_s27, 3 }
   0xc   : > { %p241_p9 = pnand %p2008_p7, %p240_p8 }
   0xe   : > { %244 = sbr.rel (%p241_p9) target bundleno = 1125 (0x465), region = 48 }
  0x13   : > { %v288_v0 = vld [vmem:[%s3789_s2 + $0x10] sm:$0xff]  ;;  %v286_v1 = vld [vmem:[%s3789_s2] sm:$0xff]  ;;  %p272_p10 = scmp.lt.s32.totalorder %s2394_s28, 1  ;;  %v556_v2 = vlaneseq  ;;  %v3795_v3 = vmov 0   ;;  %vm327_vm0 = vcmask 1043456   ;;  %v289_v11 = vld [vmem:[%s3789_s2 + $0x18] sm:$0xff] }
  0x14   : > { %2101 = vset.pattern.permute.xlu1 %v3795_v3  ;;  %2100 = vset.pattern.permute.xlu0 %v3795_v3  ;;  %v2433_v4 = vld [vmem:[%s3790_s3] sm:$0xff]  ;;  %v287_v12 = vld [vmem:[%s3789_s2 + $0x8] sm:$0xff]  ;;  %v2312_v16 = vmov 0.0   ;;  %vm320_vm3 = vcmask 64512   ;;  %s2313_s16 = smov 111   ;;  %v2471_v23 = vld [vmem:[%s3790_s3 + $0x10] sm:$0xff] }
  0x15   : > { %302 = vperm.xlu1 %2101, %v288_v0   ;;  %292 = vperm.xlu0 %2100, %v286_v1   ;;  %s273_s19 = scalar_select %p272_p10, %s2394_s28, 1  ;;  %v557_v5 = vand.u32 127, %v556_v2  ;;  %v2036_v21 = vld [vmem:[%s3788_s1] sm:$0xff]  ;;  %v2476_v24 = vld [vmem:[%s3790_s3 + $0x18] sm:$0xff]  ;;  %v2314_v25 = vmov 1   ;;  %v2484_v26 = vld [vmem:[%s3790_s3 + $0x8] sm:$0xff] }
  0x16   : > { %2102 = vset.pattern.permute.xlu2 %v3795_v3  ;;  %v2037_v27 = vld [vmem:[%s3788_s1 + $0x8] sm:$0xff]  ;;  %v2315_v28 = vmov 2   ;;  %v2316_v32 = vmov 3   ;;  %s2317_s8 = smov 113   ;;  %v2318_v33 = vmov 4   ;;  %s2319_s9 = smov 127  }
  0x17   : > { %s2035_s20 = sshll.u32 %s273_s19, 4  ;;  %636 = vperm.xlu2 %2102, %v2433_v4   ;;  %v558_v6 = vadd.s32 128, %v557_v5  ;;  %v563_v7 = vand.u32 15, %v557_v5  ;;  %vm781_vm6 = vcmask 924672   ;;  %s2320_s13 = smov 126  }
  0x18   : > { %s276_s23 = scalar_lea.vmem %s3787_s0, %s2035_s20  ;;  %s2321_s14 = smov 1  }
  0x19   : > { %v2441_v8 = vld [vmem:[%s276_s23] sm:$0xff]  ;;  %v2443_v9 = vld [vmem:[%s276_s23 + $0x8] sm:$0xff]  ;;  %v570_v10 = vand.u32 15, %v558_v6  ;;  %vm583_vm1 = vcmp.ge.s32.totalorder %v563_v7, 1  ;;  %vm589_vm4 = vcmp.le.s32.totalorder %v563_v7, 14  ;;  %s2322_s15 = smov 112  }
  0x1a   : > { %v284_v13 = vpack.c.bf16 %v2441_v8, %v2441_v8  ;;  %v285_v14 = vpack.c.bf16 %v2443_v9, %v2443_v9  ;;  %v2024_v17 = vsel %vm583_vm1, 1.0, %v2312_v16  ;;  %v2026_v29 = vsel %vm589_vm4, 1.0, %v2312_v16  ;;  %s2326_s17 = smov 15   ;;  %s2327_s18 = smov 17  }
  0x1b   : > { %vm584_vm2 = vcmp.ge.s32.totalorder %v570_v10, 1  ;;  %vm590_vm5 = vcmp.le.s32.totalorder %v570_v10, 14  ;;  %s2329_s19 = smov 110   ;;  %s2330_s22 = smov 96  }
  0x1c   : > { %v329_v18 = vsel %vm327_vm0, %v284_v13, 0  ;;  %v332_v19 = vsel %vm327_vm0, %v285_v14, 0  ;;  %v2025_v20 = vsel %vm584_vm2, 1.0, %v2312_v16  ;;  %v2027_v30 = vsel %vm590_vm5, 1.0, %v2312_v16  ;;  %s2331_s23 = smov 95   ;;  %s2332_s29 = smov 94  }
  0x1d   : > { %307 = vperm.xlu1 %2101, %v289_v11   ;;  %297 = vperm.xlu0 %2100, %v287_v12   ;;  %v2462_v22 = vpack.i.bf16 %v2025_v20, %v2024_v17  ;;  %v2494_v31 = vpack.i.bf16 %v2027_v30, %v2026_v29 }
  0x1e   : > { %341 = vmatpush.bf16.msra.mxu0 %v329_v18  ;;  %360 = vmatpush.bf16.msra.mxu1 %v332_v19 }
  0x1f   : > { %2104 = vrot.lane.b32.xlu2 %v2462_v22, %s2313_s16 }
  0x21   : > { %2020 = vmatmul.msk.bf16.vlgmr.msra.gmra.mxu0 %vm320_vm3, %v2036_v21  ;;  %2022 = vmatmul.msk.bf16.vlgmr.msra.gmra.mxu1 %vm320_vm3, %v2036_v21 }
  0x25   : > { %646 = vperm.xlu1 %2101, %v2471_v23   ;;  %2108 = vset.pattern.permute.xlu0 %v2314_v25 }
  0x26   : > { %679 = vperm.xlu0 %2108, %v2433_v4  }
  0x27   : > { %651 = vperm.xlu2 %2102, %v2476_v24  }
  0x2d   : > { %2109 = vset.pattern.permute.xlu1 %v2314_v25 }
  0x2e   : > { %683 = vperm.xlu1 %2109, %v2484_v26   ;;  %2116 = vset.pattern.permute.xlu0 %v2315_v28 }
  0x2f   : > { %799 = vperm.xlu0 %2116, %v2433_v4   ;;  %2110 = vset.pattern.permute.xlu2 %v2314_v25 }
  0x30   : > { %687 = vperm.xlu2 %2110, %v2471_v23  }
  0x31   : > { %2021 = vmatmul.msk.bf16.gmra.mxu0 %vm320_vm3, %v2037_v27  ;;  %2023 = vmatmul.msk.bf16.gmra.mxu1 %vm320_vm3, %v2037_v27 }
  0x36   : > { %691 = vperm.xlu1 %2109, %v2476_v24  }
  0x37   : > { %2124 = vset.pattern.permute.xlu0 %v2316_v32 }
  0x38   : > { %916 = vperm.xlu0 %2124, %v2433_v4   ;;  %2112 = vrot.lane.b32.xlu2 %v2494_v31, %s2317_s8  ;;  %s2038_s8 = sshll.u32 %s2394_s28, 4 }
  0x39   : > { %2118 = vset.pattern.permute.xlu2 %v2315_v28 }
  0x3e   : > { %2117 = vset.pattern.permute.xlu1 %v2315_v28 }
  0x3f   : > { %803 = vperm.xlu1 %2117, %v2484_v26  }
  0x40   : > { %2128 = vset.pattern.permute.xlu0 %v2318_v33  ;;  %807 = vperm.xlu2 %2118, %v2471_v23  }
  0x41   : > { %1017 = vperm.xlu0 %2128, %v2484_v26  }
  0x47   : > { %811 = vperm.xlu1 %2117, %v2476_v24  }
  0x48   : > { %2120 = vrot.lane.b32.xlu2 %v2462_v22, %s2319_s9 }
  0x49   : > { %2126 = vset.pattern.permute.xlu2 %v2316_v32 }
  0x4f   : > { %2125 = vset.pattern.permute.xlu1 %v2316_v32 }
  0x50   : > { %920 = vperm.xlu1 %2125, %v2484_v26   ;;  %924 = vperm.xlu2 %2126, %v2471_v23  }
  0x58   : > { %928 = vperm.xlu1 %2125, %v2476_v24   ;;  %2127 = vset.pattern.permute.xlu2 %v2318_v33 }
  0x60   : > { %2129 = vset.pattern.permute.xlu1 %v2318_v33 }
  0x61   : > { %1021 = vperm.xlu1 %2129, %v2471_v23  }
  0x71   : > { %v2509_v34 = vpop.permute.xlu2 %636 }
  0x79   : > { %v2513_v39 = vpop.permute.xlu2 %2104 }
  0x81   : > { %v2520_v43 = vpop.permute.xlu2 %651 }
  0x87   : > { %v303_v35 = vpop.permute.xlu1 %302  ;;  %v293_v36 = vpop.permute.xlu0 %292 }
  0x8a   : > { %v2533_v54 = vpop.permute.xlu2 %687 }
  0x8b   : > { %v700_v59 = vmul.f32 0.0, %v2533_v54 }
  0x8f   : > { %v2511_v37 = vpop.permute.xlu1 %307  ;;  %v298_v38 = vpop.permute.xlu0 %297 }
  0x92   : > { %v2113_v6 = vpop.permute.xlu2 %2112 }
  0x93   : > { %v2114_v12 = vunpack.i.l.bf16 %v2113_v6 }
  0x95   : > { %v2557_v18 = vmul.f32 0.0, %v2114_v12 }
  0x97   : > { %v2515_v40 = vpop.permute.xlu1 %646 }
  0x98   : > { %v2517_v41 = vpop.permute.xlu0 %679 }
  0x99   : > { %v694_v42 = vmul.f32 0.0, %v2517_v41 }
  0x9b   : > { %718 = vrot.lane.b32.xlu2 %v694_v42, %s2319_s9 }
  0x9e   : > { %v343_v44 = vpop.f32.mrf.mxu0  ;;  %v362_v45 = vpop.f32.mrf.mxu1 }
  0x9f   : > { %v2523_v46 = vadd.f32 %v343_v44, %v293_v36  ;;  %v2525_v47 = vadd.f32 %v362_v45, %v293_v36  ;;  %v2575_v45 = vpop.permute.xlu2 %807 }
  0xa0   : > { %v2527_v48 = vpop.permute.xlu1 %683 }
  0xa1   : > { %v372_v49 = vsub.f32 0.0, %v2523_v46  ;;  %v373_v50 = vsub.f32 0.0, %v2525_v47  ;;  %v697_v51 = vmul.f32 0.0, %v2527_v48  ;;  %v2563_v25 = vpop.permute.xlu0 %799 }
  0xa3   : > { %v380_v52 = vmul.f32 1.442695, %v372_v49  ;;  %v382_v53 = vmul.f32 1.442695, %v373_v50  ;;  %724 = vrot.lane.b32.xlu2 %v697_v51, %s2319_s9 }
  0xa5   : > { %2166 = vpow2.f32 %v380_v52  ;;  %v2584_v52 = vunpack.i.h.bf16 %v2113_v6 }
  0xa6   : > { %2168 = vpow2.f32 %v382_v53  ;;  %v345_v55 = vpop.f32.mrf.mxu0  ;;  %v364_v56 = vpop.f32.mrf.mxu1 }
  0xa7   : > { %v2535_v57 = vadd.f32 %v345_v55, %v298_v38  ;;  %v2537_v58 = vadd.f32 %v364_v56, %v298_v38  ;;  %v814_v38 = vmul.f32 %v2563_v25, %v2557_v18 }
  0xa8   : > { %v2547_v5 = vpop.permute.xlu1 %691 }
  0xa9   : > { %v375_v60 = vsub.f32 0.0, %v2537_v58  ;;  %v374_v61 = vsub.f32 0.0, %v2535_v57  ;;  %v703_v16 = vmul.f32 0.0, %v2547_v5 }
  0xab   : > { %v2167_v62 = vpop.eup %2166  ;;  %730 = vrot.lane.b32.xlu2 %v700_v59, %s2319_s9  ;;  %v386_v1 = vmul.f32 1.442695, %v375_v60  ;;  %v384_v7 = vmul.f32 1.442695, %v374_v61 }
  0xac   : > { %v2169_v63 = vpop.eup %2168  ;;  %v2543_v0 = vadd.f32 1.0, %v2167_v62 }
  0xad   : > { %v2545_v2 = vadd.f32 1.0, %v2169_v63  ;;  %v2596_v63 = vsel %vm781_vm6, %v2114_v12, %v2584_v52 }
  0xae   : > { %2170 = vrcp.f32 %v2543_v0  ;;  %v348_v10 = vpop.f32.mrf.mxu0  ;;  %v367_v11 = vpop.f32.mrf.mxu1  ;;  %vm409_vm10 = vweird.f32 %v2543_v0 }
  0xaf   : > { %2172 = vrcp.f32 %v2545_v2  ;;  %v2551_v13 = vadd.f32 %v348_v10, %v303_v35  ;;  %v2553_v14 = vadd.f32 %v367_v11, %v303_v35  ;;  %vm424_vm7 = vweird.f32 %v2545_v2 }
  0xb0   : > { %2174 = vpow2.f32 %v386_v1 }
  0xb1   : > { %2176 = vpow2.f32 %v384_v7  ;;  %v376_v17 = vsub.f32 0.0, %v2551_v13  ;;  %v377_v19 = vsub.f32 0.0, %v2553_v14  ;;  %v428_v7 = vand.u32 2147483647, %v2545_v2 }
  0xb3   : > { %736 = vrot.lane.b32.xlu2 %v703_v16, %s2319_s9  ;;  %v388_v21 = vmul.f32 1.442695, %v376_v17  ;;  %v390_v36 = vmul.f32 1.442695, %v377_v19  ;;  %v430_v17 = vand.u32 2147483648, %v2545_v2  ;;  %vm429_vm14 = vcmp.eq.f32.partialorder %v428_v7, 8.507059e+37 }
  0xb4   : > { %v2561_v20 = vpop.eup %2170 }
  0xb5   : > { %v2565_v27 = vpop.eup %2172  ;;  %v405_v29 = vmul.f32 %v2561_v20, %v2543_v0  ;;  %2178 = vpow2.f32 %v388_v21  ;;  %vm410_vm9 = vweird.f32 %v2561_v20 }
  0xb6   : > { %v2175_v28 = vpop.eup %2174  ;;  %v420_v30 = vmul.f32 %v2565_v27, %v2545_v2  ;;  %v350_v32 = vpop.f32.mrf.mxu0  ;;  %vm425_vm8 = vweird.f32 %v2565_v27  ;;  %vm2642_vm12 = vmor %vm409_vm10, %vm410_vm9 }
  0xb7   : > { %v369_v33 = vpop.f32.mrf.mxu1  ;;  %v2571_v35 = vadd.f32 1.0, %v2175_v28  ;;  %v2177_v42 = vpop.eup %2176  ;;  %v2578_v49 = vadd.f32 %v350_v32, %v2511_v37  ;;  %v406_v51 = vsub.f32 1.0, %v405_v29  ;;  %v413_v32 = vand.u32 2147483647, %v2543_v0  ;;  %vm2626_vm11 = vmor %vm424_vm7, %vm425_vm8 }
  0xb8   : > { %v421_v44 = vsub.f32 1.0, %v420_v30  ;;  %v2581_v50 = vadd.f32 %v369_v33, %v2511_v37  ;;  %v2586_v53 = vadd.f32 1.0, %v2177_v42  ;;  %v2592_v37 = vpop.permute.xlu1 %803  ;;  %v2617_v30 = vpop.permute.xlu2 %2120  ;;  %v415_v33 = vand.u32 2147483648, %v2543_v0 }
  0xb9   : > { %2180 = vrcp.f32 %v2571_v35  ;;  %v378_v55 = vsub.f32 0.0, %v2578_v49  ;;  %v407_v62 = vmul.f32 %v2561_v20, %v406_v51  ;;  %v817_v19 = vmul.f32 %v2592_v37, %v2557_v18 }
  0xba   : > { %2182 = vpow2.f32 %v390_v36  ;;  %v379_v56 = vsub.f32 0.0, %v2581_v50  ;;  %v422_v59 = vmul.f32 %v2565_v27, %v421_v44  ;;  %v460_v0 = vand.u32 2147483648, %v2571_v35 }
  0xbb   : > { %838 = vrot.lane.b32.xlu2 %v814_v38, %s2320_s13  ;;  %v392_v60 = vmul.f32 1.442695, %v378_v55  ;;  %v2179_v61 = vpop.eup %2178  ;;  %2184 = vrcp.f32 %v2586_v53  ;;  %v408_v21 = vadd.f32 %v2561_v20, %v407_v62  ;;  %v458_v38 = vand.u32 2147483647, %v2571_v35 }
  0xbc   : > { %v394_v1 = vmul.f32 1.442695, %v379_v56  ;;  %v2603_v10 = vadd.f32 1.0, %v2179_v61  ;;  %v423_v11 = vadd.f32 %v2565_v27, %v422_v59  ;;  %v431_v55 = vor.u32 1.1754944e-38, %v430_v17 }
  0xbd   : > { %2186 = vpow2.f32 %v392_v60  ;;  %v2650_v56 = vunpack.i.h.bf16 %v2617_v30  ;;  %v412_v60 = vsel %vm2642_vm12, %v2561_v20, %v408_v21  ;;  %vm454_vm15 = vweird.f32 %v2571_v35 }
  0xbe   : > { %2188 = vrcp.f32 %v2603_v10  ;;  %v427_v42 = vsel %vm2626_vm11, %v2565_v27, %v423_v11  ;;  %v820_v27 = vmul.f32 %v2575_v45, %v2557_v18  ;;  %vm414_vm1 = vcmp.eq.f32.partialorder %v413_v32, 8.507059e+37 }
  0xbf   : > { %v2598_v6 = vpop.eup %2180  ;;  %2190 = vpow2.f32 %v394_v1  ;;  %v2122_v1 = vunpack.i.l.bf16 %v2617_v30  ;;  %vm2668_vm3 = vcmp.eq.f32.partialorder %v458_v38, 8.507059e+37  ;;  %v461_v21 = vor.u32 1.1754944e-38, %v460_v0 }
  0xc0   : > { %v450_v16 = vmul.f32 %v2598_v6, %v2571_v35  ;;  %v2183_v12 = vpop.eup %2182  ;;  %vm455_vm13 = vweird.f32 %v2598_v6  ;;  %v2656_v62 = vpop.permute.xlu1 %811  ;;  %v475_v0 = vand.u32 2147483648, %v2603_v10  ;;  %vm469_vm5 = vweird.f32 %v2603_v10 }
  0xc1   : > { %v2615_v29 = vadd.f32 1.0, %v2183_v12  ;;  %v2638_v51 = vpop.eup %2184  ;;  %v432_v12 = vsel %vm429_vm14, %v431_v55, %v427_v42  ;;  %vm2664_vm2 = vmor %vm454_vm15, %vm455_vm13  ;;  %v823_v32 = vmul.f32 %v2656_v62, %v2557_v18  ;;  %vm742_vm11 = vcmask 1039360  }
  0xc2   : > { %v451_v28 = vsub.f32 1.0, %v450_v16  ;;  %v416_v16 = vor.u32 1.1754944e-38, %v415_v33  ;;  %v2680_v42 = vmul.f32 %v432_v12, %v2525_v47  ;;  %v2686_v2 = vmul.f32 %v2638_v51, %v2586_v53 }
  0xc3   : > { %844 = vrot.lane.b32.xlu2 %v817_v19, %s2320_s13  ;;  %2192 = vrcp.f32 %v2615_v29  ;;  %v2187_v59 = vpop.eup %2186  ;;  %v488_v55 = vand.u32 2147483647, %v2615_v29  ;;  %vm484_vm8 = vweird.f32 %v2615_v29 }
  0xc4   : > { %v452_v44 = vmul.f32 %v2598_v6, %v451_v28  ;;  %v2189_v11 = vpop.eup %2188  ;;  %v2660_v17 = vadd.f32 1.0, %v2187_v59  ;;  %v417_v33 = vsel %vm414_vm1, %v416_v16, %v412_v60  ;;  %v490_v60 = vand.u32 2147483648, %v2615_v29 }
  0xc5   : > { %v2191_v19 = vpop.eup %2190  ;;  %v465_v28 = vmul.f32 %v2189_v11, %v2603_v10  ;;  %vm470_vm4 = vweird.f32 %v2189_v11  ;;  %vm2707_vm10 = vcmp.eq.f32.partialorder %v488_v55, 8.507059e+37 }
  0xc6   : > { %v453_v61 = vadd.f32 %v2598_v6, %v452_v44  ;;  %2194 = vrcp.f32 %v2660_v17  ;;  %v473_v44 = vand.u32 2147483647, %v2603_v10  ;;  %v2690_v59 = vadd.f32 1.0, %v2191_v19  ;;  %vm471_vm7 = vmor %vm469_vm5, %vm470_vm4 }
  0xc7   : > { %v466_v38 = vsub.f32 1.0, %v465_v28  ;;  %v476_v19 = vor.u32 1.1754944e-38, %v475_v0  ;;  %v491_v28 = vor.u32 1.1754944e-38, %v490_v60  ;;  %v505_v60 = vand.u32 2147483648, %v2660_v17 }
  0xc8   : > { %v457_v35 = vsel %vm2664_vm2, %v2598_v6, %v453_v61  ;;  %v2697_v61 = vmul.f32 %v417_v33, %v2523_v46  ;;  %2196 = vrcp.f32 %v2690_v59  ;;  %vm474_vm6 = vcmp.eq.f32.partialorder %v473_v44, 8.507059e+37 }
  0xc9   : > { %v2193_v36 = vpop.eup %2192  ;;  %v462_v47 = vsel %vm2668_vm3, %v461_v21, %v457_v35  ;;  %v467_v18 = vmul.f32 %v2189_v11, %v466_v38  ;;  %v2712_v35 = vpop.permute.xlu0 %916  ;;  %vm499_vm14 = vweird.f32 %v2660_v17  ;;  %vm514_vm3 = vweird.f32 %v2690_v59 }
  0xca   : > { %v480_v6 = vmul.f32 %v2193_v36, %v2615_v29  ;;  %v2704_v7 = vmul.f32 %v462_v47, %v2537_v58  ;;  %vm485_vm9 = vweird.f32 %v2193_v36  ;;  %v696_v29 = vmul.f32 %v2517_v41, %v2680_v42 }
  0xcb   : > { %850 = vrot.lane.b32.xlu2 %v820_v27, %s2320_s13  ;;  %v468_v12 = vadd.f32 %v2189_v11, %v467_v18  ;;  %v905_v27 = vmul.f32 %v2650_v56, %v2680_v42  ;;  %vm486_vm12 = vmor %vm484_vm8, %vm485_vm9  ;;  %v695_v55 = vmul.f32 %v2517_v41, %v2697_v61 }
  0xcc   : > { %v481_v16 = vsub.f32 1.0, %v480_v6  ;;  %v2195_v20 = vpop.eup %2194  ;;  %v503_v6 = vand.u32 2147483647, %v2660_v17  ;;  %722 = vrot.lane.b32.xlu1 %v696_v29, %s2319_s9 }
  0xcd   : > { %v472_v46 = vsel %vm471_vm7, %v2189_v11, %v468_v12  ;;  %v495_v33 = vmul.f32 %v2195_v20, %v2660_v17  ;;  %v2715_v58 = vmul.f32 %v2712_v35, %v905_v27  ;;  %vm500_vm13 = vweird.f32 %v2195_v20  ;;  %720 = vrot.lane.b32.xlu0 %v695_v55, %s2319_s9 }
  0xce   : > { %v482_v21 = vmul.f32 %v2193_v36, %v481_v16  ;;  %v477_v38 = vsel %vm474_vm6, %v476_v19, %v472_v46  ;;  %v2197_v47 = vpop.eup %2196  ;;  %v2727_v16 = vpop.permute.xlu1 %920  ;;  %vm501_vm15 = vmor %vm499_vm14, %vm500_vm13  ;;  %vm504_vm1 = vcmp.eq.f32.partialorder %v503_v6, 8.507059e+37  ;;  %v518_v55 = vand.u32 2147483647, %v2690_v59 }
  0xcf   : > { %v2720_v11 = vmul.f32 %v477_v38, %v2551_v13  ;;  %v496_v0 = vsub.f32 1.0, %v495_v33  ;;  %v908_v13 = vmul.f32 %v2650_v56, %v2704_v7  ;;  %v510_v41 = vmul.f32 %v2197_v47, %v2690_v59  ;;  %v2752_v38 = vpop.permute.xlu2 %924 }
  0xd0   : > { %v483_v44 = vadd.f32 %v2193_v36, %v482_v21  ;;  %v2742_v21 = vmul.f32 0.0, %v2122_v1  ;;  %vm515_vm2 = vweird.f32 %v2197_v47  ;;  %vm519_vm5 = vcmp.eq.f32.partialorder %v518_v55, 8.507059e+37 }
  0xd1   : > { %v793_v19 = vmul.f32 %v2596_v63, %v2720_v11  ;;  %v497_v27 = vmul.f32 %v2195_v20, %v496_v0  ;;  %v2745_v46 = vmul.f32 %v2727_v16, %v908_v13  ;;  %v511_v33 = vsub.f32 1.0, %v510_v41  ;;  %vm516_vm4 = vmor %vm514_vm3, %vm515_vm2 }
  0xd2   : > { %v487_v18 = vsel %vm486_vm12, %v2193_v36, %v483_v44  ;;  %v520_v44 = vand.u32 2147483648, %v2690_v59  ;;  %v931_v17 = vmul.f32 %v2712_v35, %v2742_v21  ;;  %vm440_vm6 = vweird.f32 %v2638_v51 }
  0xd3   : > { %v492_v12 = vsel %vm2707_vm10, %v491_v28, %v487_v18  ;;  %856 = vrot.lane.b32.xlu2 %v823_v32, %s2320_s13  ;;  %v2749_v10 = vmul.f32 %v2575_v45, %v793_v19  ;;  %v498_v28 = vadd.f32 %v2195_v20, %v497_v27  ;;  %v512_v32 = vmul.f32 %v2197_v47, %v511_v33 }
  0xd4   : > { %v2738_v36 = vmul.f32 %v492_v12, %v2553_v14  ;;  %v506_v14 = vor.u32 1.1754944e-38, %v505_v60  ;;  %v436_v12 = vsub.f32 1.0, %v2686_v2  ;;  %v2773_v19 = vsel %vm742_vm11, %v2122_v1, %v2650_v56 }
  0xd5   : > { %v502_v0 = vsel %vm501_vm15, %v2195_v20, %v498_v28  ;;  %v513_v60 = vadd.f32 %v2197_v47, %v512_v32  ;;  %v521_v20 = vor.u32 1.1754944e-38, %v520_v44  ;;  %2131 = vrot.lane.b32.xlu0 %v2494_v31, %s2321_s14  ;;  %v787_v1 = vmul.f32 %v2596_v63, %v2697_v61 }
  0xd6   : > { %v911_v29 = vmul.f32 %v2650_v56, %v2738_v36  ;;  %v507_v18 = vsel %vm504_vm1, %v506_v14, %v502_v0  ;;  %v929_v59 = vpop.permute.xlu1 %928  ;;  %v437_v33 = vmul.f32 %v2638_v51, %v436_v12  ;;  %v445_v32 = vand.u32 2147483648, %v2586_v53 }
  0xd7   : > { %v2765_v6 = vmul.f32 %v507_v18, %v2578_v49  ;;  %v517_v27 = vsel %vm516_vm4, %v2197_v47, %v513_v60  ;;  %v815_v44 = vmul.f32 %v2563_v25, %v787_v1  ;;  %vm439_vm7 = vweird.f32 %v2586_v53 }
  0xd8   : > { %v2762_v13 = vmul.f32 %v2752_v38, %v911_v29  ;;  %v522_v2 = vsel %vm519_vm5, %v521_v20, %v517_v27  ;;  %v438_v0 = vadd.f32 %v2638_v51, %v437_v33  ;;  %v904_v55 = vmul.f32 %v2773_v19, %v2697_v61  ;;  %vm441_vm8 = vmor %vm439_vm7, %vm440_vm6 }
  0xd9   : > { %v796_v41 = vmul.f32 %v2596_v63, %v2765_v6  ;;  %v913_v49 = vmul.f32 %v2773_v19, %v2765_v6  ;;  %v2782_v30 = vmul.f32 %v522_v2, %v2581_v50  ;;  %v934_v50 = vmul.f32 %v2727_v16, %v2742_v21 }
  0xda   : > { %v442_v18 = vsel %vm441_vm8, %v2638_v51, %v438_v0  ;;  %v932_v60 = vmul.f32 %v2712_v35, %v904_v55  ;;  %v937_v20 = vmul.f32 %v2752_v38, %v2742_v21  ;;  %v940_v51 = vmul.f32 %v929_v59, %v2742_v21 }
  0xdb   : > { %955 = vrot.lane.b32.xlu2 %v931_v17, %s2322_s15  ;;  %v2787_v47 = vmul.f32 %v2656_v62, %v796_v41  ;;  %v2789_v28 = vmul.f32 %v929_v59, %v913_v49  ;;  %v914_v14 = vmul.f32 %v2650_v56, %v2782_v30  ;;  %v443_v56 = vand.u32 2147483647, %v2586_v53  ;;  %v2822_v41 = vpop.permute.xlu0 %1017 }
  0xdc   : > { %v446_v17 = vor.u32 1.1754944e-38, %v445_v32  ;;  %v2323_v55 = vmov 5   ;;  %vm862_vm10 = vcmask 1031168   ;;  %vm979_vm12 = vcmask 916480  }
  0xdd   : > { %v2795_v29 = vmul.f32 %v929_v59, %v914_v14  ;;  %840 = vrot.lane.b32.xlu0 %v815_v44, %s2320_s13  ;;  %vm444_vm9 = vcmp.eq.f32.partialorder %v443_v56, 8.507059e+37  ;;  %v910_v56 = vmul.f32 %v2773_v19, %v2720_v11  ;;  %2135 = vset.pattern.permute.xlu1 %v2323_v55  ;;  %vm1104_vm13 = vcmask 7168  }
  0xde   : > { %v447_v12 = vsel %vm444_vm9, %v446_v17, %v442_v18  ;;  %2141 = vset.pattern.permute.xlu0 %v2323_v55  ;;  %vm617_vm14 = vcmask 908288   ;;  %vm1222_vm15 = vcmask 121856   ;;  %vm1185_vm1 = vcmask 900096  }
  0xdf   : > { %v2815_v53 = vmul.f32 %v447_v12, %v2535_v57  ;;  %v938_v18 = vmul.f32 %v2752_v38, %v910_v56  ;;  %v3798_v12 = vmov 6   ;;  %vm1437_vm2 = vcmask 138240  }
  0xe0   : > { %vm1303_vm3 = vcmask 785408   ;;  %vm1518_vm4 = vcmask 769024  }
  0xe1   : > { %v698_v27 = vmul.f32 %v2527_v48, %v2815_v53  ;;  %v1030_v49 = vmul.f32 %v2822_v41, %v2815_v53  ;;  %v790_v2 = vmul.f32 %v2596_v63, %v2815_v53  ;;  %v907_v1 = vmul.f32 %v2773_v19, %v2815_v53 }
  0xe2   : > { %v701_v63 = vmul.f32 %v2533_v54, %v2720_v11 }
  0xe3   : > { %961 = vrot.lane.b32.xlu2 %v934_v50, %s2322_s15  ;;  %v818_v21 = vmul.f32 %v2592_v37, %v790_v2  ;;  %v935_v33 = vmul.f32 %v2727_v16, %v907_v1  ;;  %v1022_v50 = vpop.permute.xlu1 %1021 }
  0xe4   : > { %v1033_v0 = vmul.f32 %v1022_v50, %v2738_v36 }
  0xe5   : > { %957 = vrot.lane.b32.xlu0 %v932_v60, %s2322_s15  ;;  %v704_v60 = vmul.f32 %v2547_v5, %v2765_v6 }
  0xeb   : > { %967 = vrot.lane.b32.xlu2 %v937_v20, %s2322_s15 }
  0xed   : > { %726 = vrot.lane.b32.xlu0 %v698_v27, %s2319_s9  ;;  %v2106_v27 = vunpack.i.l.bf16 %v2513_v39 }
  0xf3   : > { %973 = vrot.lane.b32.xlu2 %v940_v51, %s2322_s15 }
  0xf5   : > { %v719_v35 = vpop.permute.xlu2 %718  ;;  %1048 = vrot.lane.b32.xlu0 %v1030_v49, %s2313_s16 }
  0xfb   : > { %1013 = vperm.xlu2 %2127, %v2433_v4  }
  0xfd   : > { %v2828_v57 = vpop.permute.xlu2 %724  ;;  %846 = vrot.lane.b32.xlu0 %v818_v21, %s2320_s13 }
  0xfe   : > { %3812 = vst [vmem:[#allocation6_spill] sm:$0xff] %v2828_v57 }
 0x103   : > { %1025 = vperm.xlu2 %2127, %v2476_v24  }
 0x105   : > { %v2835_v59 = vpop.permute.xlu2 %730  ;;  %963 = vrot.lane.b32.xlu0 %v935_v33, %s2322_s15 }
 0x10b   : > { %2142 = vset.pattern.permute.xlu2 %v3798_v12 }
 0x10d   : > { %v2841_v14 = vpop.permute.xlu2 %736  ;;  %732 = vrot.lane.b32.xlu0 %v701_v63, %s2319_s9 }
 0x115   : > { %v839_v44 = vpop.permute.xlu2 %838  ;;  %1054 = vrot.lane.b32.xlu0 %v1033_v0, %s2313_s16 }
 0x11d   : > { %v2848_v32 = vpop.permute.xlu2 %844  ;;  %852 = vrot.lane.b32.xlu0 %v2749_v10, %s2320_s13 }
 0x11e   : > { %3813 = vst [vmem:[#allocation7_spill] sm:$0xff] %v2848_v32 }
 0x125   : > { %v2852_v16 = vpop.permute.xlu2 %850  ;;  %969 = vrot.lane.b32.xlu0 %v938_v18, %s2322_s15  ;;  %v1032_v18 = vmul.f32 %v1022_v50, %v2720_v11 }
 0x12d   : > { %v2858_v17 = vpop.permute.xlu2 %856  ;;  %738 = vrot.lane.b32.xlu0 %v704_v60, %s2319_s9 }
 0x135   : > { %v956_v10 = vpop.permute.xlu2 %955  ;;  %858 = vrot.lane.b32.xlu0 %v2787_v47, %s2320_s13  ;;  %v2882_v47 = vmul.f32 0.0, %v2106_v27 }
 0x13d   : > { %v2866_v19 = vpop.permute.xlu2 %961  ;;  %975 = vrot.lane.b32.xlu0 %v2789_v28, %s2322_s15  ;;  %v654_v28 = vmul.f32 %v2509_v34, %v2882_v47 }
 0x13e   : > { %3814 = vst [vmem:[#allocation8_spill] sm:$0xff] %v2866_v19 }
 0x13f   : > { %v2870_v38 = vpop.permute.xlu0 %720 }
 0x140   : > { %v743_v2 = vsel %vm742_vm11, %v719_v35, %v2870_v38 }
 0x141   : > { %v763_v21 = vadd.f32 %v743_v2, %v654_v28  ;;  %v788_v2 = vmul.f32 %v2584_v52, %v2680_v42  ;;  %v3797_v28 = vmov 7  }
 0x145   : > { %v2872_v20 = vpop.permute.xlu2 %967  ;;  %1130 = vperm.xlu0 %2141, %v2471_v23  }
 0x147   : > { %v2876_v51 = vpop.permute.xlu0 %2131 }
 0x14d   : > { %v2878_v49 = vpop.permute.xlu2 %973  ;;  %1126 = vperm.xlu0 %2141, %v2484_v26  }
 0x14f   : > { %v2889_v1 = vpop.permute.xlu0 %840 }
 0x150   : > { %v863_v33 = vsel %vm862_vm10, %v839_v44, %v2889_v1 }
 0x151   : > { %v883_v0 = vadd.f32 %v863_v33, %v763_v21 }
 0x155   : > { %v1014_v63 = vpop.permute.xlu2 %1013  ;;  %2151 = vset.pattern.permute.xlu0 %v3798_v12 }
 0x156   : > { %v1028_v56 = vmul.f32 %v1014_v63, %v2697_v61  ;;  %v1029_v55 = vmul.f32 %v1014_v63, %v2680_v42  ;;  %1240 = vperm.xlu0 %2151, %v2433_v4  }
 0x157   : > { %v2899_v35 = vpop.permute.xlu0 %957 }
 0x158   : > { %1046 = vrot.lane.b32.xlu2 %v1029_v55, %s2313_s16  ;;  %1044 = vrot.lane.b32.xlu1 %v1028_v56, %s2313_s16  ;;  %v980_v44 = vsel %vm979_vm12, %v956_v10, %v2899_v35  ;;  %v816_v10 = vmul.f32 %v2563_v25, %v788_v2  ;;  %v699_v25 = vmul.f32 %v2527_v48, %v2704_v7 }
 0x159   : > { %v2904_v60 = vadd.f32 %v980_v44, %v883_v0  ;;  %v1031_v55 = vmul.f32 %v2822_v41, %v2704_v7  ;;  %v3796_v44 = vmov 8  }
 0x15d   : > { %v1026_v21 = vpop.permute.xlu2 %1025 }
 0x15e   : > { %2156 = vset.pattern.permute.xlu0 %v3797_v28  ;;  %v1035_v50 = vmul.f32 %v1026_v21, %v2782_v30 }
 0x15f   : > { %1341 = vperm.xlu0 %2156, %v2484_v26   ;;  %v2912_v33 = vpop.permute.xlu0 %726 }
 0x160   : > { %1052 = vrot.lane.b32.xlu2 %v1032_v18, %s2313_s16  ;;  %1122 = vperm.xlu1 %2135, %v2433_v4   ;;  %v702_v18 = vmul.f32 %v2533_v54, %v2738_v36 }
 0x167   : > { %2157 = vset.pattern.permute.xlu0 %v3795_v3  ;;  %v2919_v63 = vpop.permute.xlu0 %1048 }
 0x168   : > { %1058 = vrot.lane.b32.xlu2 %v1035_v50, %s2313_s16  ;;  %842 = vrot.lane.b32.xlu1 %v816_v10, %s2320_s13  ;;  %3815 = vst [vmem:[#allocation9_spill] sm:$0xff] %v2919_v63  ;;  %v2979_v50 = vunpack.i.l.bf16 %v2876_v51 }
 0x169   : > { %641 = vperm.xlu0 %2157, %v2484_v26  }
 0x16f   : > { %v2925_v0 = vpop.permute.xlu0 %846 }
 0x170   : > { %2137 = vrot.lane.b32.xlu2 %v2462_v22, %s2326_s17  ;;  %959 = vrot.lane.b32.xlu1 %v2715_v58, %s2322_s15  ;;  %v791_v22 = vmul.f32 %v2584_v52, %v2704_v7 }
 0x172   : > { %v819_v58 = vmul.f32 %v2592_v37, %v791_v22  ;;  %v794_v37 = vmul.f32 %v2584_v52, %v2738_v36 }
 0x177   : > { %v2931_v56 = vpop.permute.xlu0 %963 }
 0x178   : > { %1248 = vperm.xlu2 %2142, %v2471_v23   ;;  %728 = vrot.lane.b32.xlu1 %v699_v25, %s2319_s9 }
 0x17f   : > { %v2941_v48 = vpop.permute.xlu0 %732 }
 0x180   : > { %2145 = vrot.lane.b32.xlu2 %v2494_v31, %s2327_s18  ;;  %1050 = vrot.lane.b32.xlu1 %v1031_v55, %s2313_s16  ;;  %v1034_v55 = vmul.f32 %v1026_v21, %v2765_v6 }
 0x181   : > { %2150 = vset.pattern.permute.xlu2 %v3797_v28 }
 0x187   : > { %v2946_v41 = vpop.permute.xlu0 %1054 }
 0x188   : > { %1349 = vperm.xlu2 %2150, %v2476_v24   ;;  %848 = vrot.lane.b32.xlu1 %v819_v58, %s2320_s13  ;;  %v1115_v58 = vmul.f32 %v2979_v50, %v2720_v11 }
 0x18f   : > { %v2952_v31 = vpop.permute.xlu0 %852 }
 0x190   : > { %2153 = vset.pattern.permute.xlu2 %v3796_v44  ;;  %965 = vrot.lane.b32.xlu1 %v2745_v46, %s2322_s15  ;;  %v822_v46 = vmul.f32 %v2575_v45, %v794_v37  ;;  %v2134_v45 = vunpack.i.h.bf16 %v2876_v51 }
 0x191   : > { %1463 = vperm.xlu2 %2153, %v2471_v23  }
 0x192   : > { %v2988_v22 = vmul.f32 0.0, %v2134_v45 }
 0x197   : > { %v2961_v2 = vpop.permute.xlu0 %969 }
 0x198   : > { %734 = vrot.lane.b32.xlu1 %v702_v18, %s2319_s9 }
 0x199   : > { %2155 = vset.pattern.permute.xlu2 %v3797_v28 }
 0x19a   : > { %1337 = vperm.xlu2 %2155, %v2433_v4   ;;  %v705_v4 = vmul.f32 %v2547_v5, %v2782_v30  ;;  %v797_v5 = vmul.f32 %v2584_v52, %v2782_v30  ;;  %v723_v52 = vpop.permute.xlu1 %722 }
 0x19f   : > { %v2967_v54 = vpop.permute.xlu0 %738 }
 0x1a0   : > { %854 = vrot.lane.b32.xlu1 %v822_v46, %s2320_s13 }
 0x1a2   : > { %2158 = vset.pattern.permute.xlu2 %v3796_v44 }
 0x1a3   : > { %1459 = vperm.xlu2 %2158, %v2484_v26  }
 0x1a7   : > { %v2972_v10 = vpop.permute.xlu0 %858 }
 0x1a8   : > { %971 = vrot.lane.b32.xlu1 %v2762_v13, %s2322_s15  ;;  %v2985_v13 = vsel %vm1104_vm13, %v2979_v50, %v2134_v45 }
 0x1a9   : > { %v1116_v51 = vmul.f32 %v2985_v13, %v2738_v36 }
 0x1ab   : > { %2160 = vset.pattern.permute.xlu2 %v3795_v3 }
 0x1af   : > { %v2981_v25 = vpop.permute.xlu0 %975 }
 0x1b0   : > { %740 = vrot.lane.b32.xlu1 %v705_v4, %s2319_s9  ;;  %v825_v4 = vmul.f32 %v2656_v62, %v797_v5  ;;  %v3010_v62 = vunpack.i.h.bf16 %v2513_v39  ;;  %v1109_v5 = vmul.f32 %v2979_v50, %v2697_v61 }
 0x1b2   : > { %v1047_v45 = vpop.permute.xlu2 %1046  ;;  %v624_v39 = vmul.f32 %v3010_v62, %v2680_v42 }
 0x1b4   : > { %v656_v28 = vmul.f32 %v2509_v34, %v624_v39  ;;  %v3820_v39 = vmov 8  }
 0x1b7   : > { %v1131_v18 = vpop.permute.xlu0 %1130 }
 0x1b8   : > { %1056 = vrot.lane.b32.xlu1 %v1034_v55, %s2313_s16  ;;  %v2996_v37 = vmul.f32 %v1131_v18, %v1115_v58  ;;  %v1144_v21 = vmul.f32 %v1131_v18, %v1116_v51  ;;  %v1145_v46 = vmul.f32 %v1131_v18, %v2988_v22 }
 0x1ba   : > { %1177 = vrot.lane.b32.xlu0 %v1145_v46, %s2329_s19  ;;  %1175 = vrot.lane.b32.xlu2 %v1144_v21, %s2329_s19  ;;  %v3023_v21 = vsel %vm617_vm14, %v2106_v27, %v3010_v62 }
 0x1bb   : > { %v623_v46 = vmul.f32 %v3023_v21, %v2697_v61 }
 0x1bd   : > { %v655_v15 = vmul.f32 %v2509_v34, %v623_v46  ;;  %v3817_v46 = vmov 7   ;;  %v3819_v34 = vmov 6  }
 0x1bf   : > { %v3036_v3 = vpop.permute.xlu0 %1126 }
 0x1c0   : > { %860 = vrot.lane.b32.xlu1 %v825_v4, %s2320_s13 }
 0x1c8   : > { %977 = vrot.lane.b32.xlu1 %v2795_v29, %s2322_s15  ;;  %v1110_v29 = vmul.f32 %v2985_v13, %v2680_v42  ;;  %v3045_v19 = vpop.permute.xlu0 %1240  ;;  %s1941_s15 = scalar_lea.hbm %s3794_s7, %s2038_s8 }
 0x1ca   : > { %v1045_v55 = vpop.permute.xlu1 %1044 }
 0x1cb   : > { %v1060_v58 = vsel %vm617_vm14, %v1045_v55, %v1047_v45  ;;  %v3007_v51 = vadd.f32 %v1045_v55, %v2904_v60  ;;  %v744_v55 = vsel %vm742_vm11, %v2870_v38, %v723_v52  ;;  %v765_v38 = vadd.f32 %v723_v52, %v656_v28 }
 0x1cc   : > { %v764_v27 = vadd.f32 %v744_v55, %v655_v15 }
 0x1cd   : > { %3816 = vst [vmem:[#allocation10_spill] sm:$0xff] %v3007_v51 }
 0x1d0   : > { %1134 = vperm.xlu1 %2135, %v2476_v24  }
 0x1d2   : > { %v3015_v18 = vpop.permute.xlu1 %1122 }
 0x1d3   : > { %v3026_v60 = vmul.f32 %v3015_v18, %v1109_v5  ;;  %v3031_v4 = vmul.f32 %v3015_v18, %v1110_v29 }
 0x1d8   : > { %2143 = vset.pattern.permute.xlu1 %v3798_v12 }
 0x1d9   : > { %1252 = vperm.xlu1 %2143, %v2476_v24  }
 0x1da   : > { %v843_v5 = vpop.permute.xlu1 %842 }
 0x1db   : > { %v864_v29 = vsel %vm862_vm10, %v2889_v1, %v843_v5  ;;  %v885_v51 = vadd.f32 %v843_v5, %v765_v38  ;;  %v2246_v38 = vld [vmem:[%s3790_s3] sm:$0xff] }
 0x1dc   : > { %v884_v44 = vadd.f32 %v864_v29, %v764_v27  ;;  %v3055_v27 = vpop.permute.xlu0 %1341 }
 0x1e1   : > { %2149 = vset.pattern.permute.xlu1 %v3817_v46 }
 0x1e2   : > { %1345 = vperm.xlu1 %2149, %v2471_v23   ;;  %v960_v12 = vpop.permute.xlu1 %959 }
 0x1e3   : > { %v981_v32 = vsel %vm979_vm12, %v2899_v35, %v960_v12  ;;  %v1002_v55 = vadd.f32 %v960_v12, %v885_v51  ;;  %v626_v12 = vmul.f32 %v3023_v21, %v2815_v53 }
 0x1e4   : > { %v1001_v15 = vadd.f32 %v981_v32, %v884_v44  ;;  %v3060_v23 = vpop.permute.xlu0 %641  ;;  %v627_v32 = vmul.f32 %v3010_v62, %v2704_v7 }
 0x1e5   : > { %v3051_v57 = vadd.f32 %v1047_v45, %v1002_v55 }
 0x1e6   : > { %v3053_v1 = vadd.f32 %v1060_v58, %v1001_v15  ;;  %v659_v35 = vmul.f32 %v3060_v23, %v627_v32  ;;  %v3822_v32 = vmov 0  }
 0x1e8   : > { %3818 = vst [vmem:[#allocation11_spill] sm:$0xff] %v3053_v1 }
 0x1ea   : > { %2152 = vset.pattern.permute.xlu1 %v3819_v34  ;;  %v729_v28 = vpop.permute.xlu1 %728 }
 0x1eb   : > { %1244 = vperm.xlu1 %2152, %v2484_v26   ;;  %v746_v44 = vsel %vm742_vm11, %v2912_v33, %v729_v28  ;;  %v658_v26 = vmul.f32 %v3060_v23, %v626_v12  ;;  %v768_v45 = vadd.f32 %v729_v28, %v659_v35 }
 0x1ed   : > { %v767_v58 = vadd.f32 %v746_v44, %v658_v26  ;;  %v630_v44 = vmul.f32 %v3010_v62, %v2738_v36  ;;  %v629_v26 = vmul.f32 %v3023_v21, %v2720_v11 }
 0x1f2   : > { %v1051_v52 = vpop.permute.xlu1 %1050 }
 0x1f3   : > { %2154 = vset.pattern.permute.xlu1 %v3820_v39  ;;  %v1061_v28 = vsel %vm617_vm14, %v2919_v63, %v1051_v52 }
 0x1f4   : > { %1467 = vperm.xlu1 %2154, %v2476_v24  }
 0x1fa   : > { %v849_v51 = vpop.permute.xlu1 %848 }
 0x1fb   : > { %v866_v5 = vsel %vm862_vm10, %v2925_v0, %v849_v51  ;;  %v888_v24 = vadd.f32 %v849_v51, %v768_v45  ;;  %v662_v45 = vmul.f32 %v2515_v40, %v630_v44 }
 0x1fc   : > { %v887_v29 = vadd.f32 %v866_v5, %v767_v58  ;;  %1455 = vperm.xlu1 %2154, %v2246_v38   ;;  %v661_v58 = vmul.f32 %v2515_v40, %v629_v26 }
 0x202   : > { %v966_v46 = vpop.permute.xlu1 %965 }
 0x203   : > { %v983_v15 = vsel %vm979_vm12, %v2931_v56, %v966_v46  ;;  %v1005_v55 = vadd.f32 %v966_v46, %v888_v24  ;;  %v3097_v46 = vpop.permute.xlu2 %1052 }
 0x204   : > { %v1004_v34 = vadd.f32 %v983_v15, %v887_v29  ;;  %1173 = vrot.lane.b32.xlu1 %v2996_v37, %s2329_s19 }
 0x205   : > { %v3082_v39 = vadd.f32 %v1051_v52, %v1005_v55  ;;  %2159 = vset.pattern.permute.xlu1 %v3822_v32  ;;  %v1062_v32 = vsel %vm617_vm14, %v3097_v46, %v2946_v41 }
 0x206   : > { %v3085_v12 = vadd.f32 %v1061_v28, %v1004_v34 }
 0x207   : > { %3821 = vst [vmem:[#allocation12_spill] sm:$0xff] %v3082_v39 }
 0x208   : > { %3823 = vst [vmem:[#allocation13_spill] sm:$0xff] %v3085_v12 }
 0x20a   : > { %v735_v35 = vpop.permute.xlu1 %734 }
 0x20b   : > { %v748_v37 = vsel %vm742_vm11, %v2941_v48, %v735_v35  ;;  %v771_v52 = vadd.f32 %v735_v35, %v662_v45  ;;  %v3108_v26 = vpop.permute.xlu2 %1058 }
 0x20c   : > { %v770_v51 = vadd.f32 %v748_v37, %v661_v58  ;;  %v633_v37 = vmul.f32 %v3010_v62, %v2782_v30  ;;  %v632_v58 = vmul.f32 %v3023_v21, %v2765_v6 }
 0x212   : > { %v855_v5 = vpop.permute.xlu1 %854 }
 0x213   : > { %v868_v24 = vsel %vm862_vm10, %v2952_v31, %v855_v5  ;;  %v891_v29 = vadd.f32 %v855_v5, %v771_v52  ;;  %v665_v52 = vmul.f32 %v2520_v43, %v633_v37  ;;  %v664_v5 = vmul.f32 %v2520_v43, %v632_v58 }
 0x214   : > { %v890_v38 = vadd.f32 %v868_v24, %v770_v51 }
 0x21a   : > { %v972_v15 = vpop.permute.xlu1 %971 }
 0x21b   : > { %v985_v55 = vsel %vm979_vm12, %v2961_v2, %v972_v15  ;;  %v3101_v34 = vadd.f32 %v972_v15, %v891_v29  ;;  %v2138_v29 = vpop.permute.xlu2 %2137 }
 0x21c   : > { %v1007_v28 = vadd.f32 %v985_v55, %v890_v38 }
 0x21e   : > { %v3106_v35 = vadd.f32 %v1062_v32, %v1007_v28 }
 0x222   : > { %v741_v44 = vpop.permute.xlu1 %740 }
 0x223   : > { %v750_v51 = vsel %vm742_vm11, %v2967_v54, %v741_v44  ;;  %v774_v24 = vadd.f32 %v741_v44, %v665_v52  ;;  %v1249_v37 = vpop.permute.xlu2 %1248  ;;  %v1118_v52 = vmul.f32 %v2979_v50, %v2765_v6 }
 0x224   : > { %v773_v38 = vadd.f32 %v750_v51, %v664_v5  ;;  %v1119_v51 = vmul.f32 %v2985_v13, %v2782_v30  ;;  %v2140_v5 = vunpack.i.h.bf16 %v2138_v29 }
 0x22a   : > { %v3110_v45 = vpop.permute.xlu1 %1056 }
 0x22b   : > { %v1063_v44 = vsel %vm617_vm14, %v3110_v45, %v3108_v26 }
 0x232   : > { %v861_v15 = vpop.permute.xlu1 %860 }
 0x233   : > { %v870_v55 = vsel %vm862_vm10, %v2972_v10, %v861_v15  ;;  %v894_v28 = vadd.f32 %v861_v15, %v774_v24 }
 0x234   : > { %v893_v32 = vadd.f32 %v870_v55, %v773_v38  ;;  %v3135_v38 = vunpack.i.l.bf16 %v2138_v29 }
 0x236   : > { %v1233_v29 = vmul.f32 %v3135_v38, %v2720_v11 }
 0x23a   : > { %v978_v62 = vpop.permute.xlu1 %977 }
 0x23b   : > { %v987_v21 = vsel %vm979_vm12, %v2981_v25, %v978_v62  ;;  %v3124_v12 = vadd.f32 %v978_v62, %v894_v28  ;;  %v3146_v62 = vsel %vm1222_vm15, %v3135_v38, %v2140_v5 }
 0x23c   : > { %v1010_v39 = vadd.f32 %v987_v21, %v893_v32  ;;  %v3143_v32 = vmul.f32 0.0, %v2140_v5  ;;  %v1234_v21 = vmul.f32 %v3146_v62, %v2738_v36 }
 0x23e   : > { %v3129_v58 = vadd.f32 %v1063_v44, %v1010_v39  ;;  %v3140_v39 = vpop.permute.xlu2 %2145  ;;  %v1261_v44 = vmul.f32 %v1249_v37, %v1233_v29 }
 0x242   : > { %v1135_v24 = vpop.permute.xlu1 %1134 }
 0x243   : > { %v1146_v15 = vmul.f32 %v1135_v24, %v1118_v52  ;;  %v1147_v55 = vmul.f32 %v1135_v24, %v1119_v51  ;;  %v1148_v28 = vmul.f32 %v1135_v24, %v2988_v22  ;;  %v1263_v52 = vmul.f32 %v1249_v37, %v3143_v32 }
 0x244   : > { %v1262_v24 = vmul.f32 %v1249_v37, %v1234_v21  ;;  %v1139_v21 = vmul.f32 %v3015_v18, %v2988_v22  ;;  %v1142_v18 = vmul.f32 %v3036_v3, %v2988_v22 }
 0x245   : > { %1183 = vrot.lane.b32.xlu0 %v1148_v28, %s2329_s19  ;;  %1179 = vrot.lane.b32.xlu1 %v1146_v15, %s2329_s19  ;;  %v1236_v15 = vmul.f32 %v3135_v38, %v2765_v6 }
 0x246   : > { %1181 = vrot.lane.b32.xlu2 %v1147_v55, %s2329_s19  ;;  %v1350_v5 = vpop.permute.xlu2 %1349  ;;  %v1237_v55 = vmul.f32 %v3146_v62, %v2782_v30 }
 0x24b   : > { %v1253_v51 = vpop.permute.xlu1 %1252 }
 0x24c   : > { %v1264_v28 = vmul.f32 %v1253_v51, %v1236_v15  ;;  %v1266_v29 = vmul.f32 %v1253_v51, %v3143_v32  ;;  %v1265_v63 = vmul.f32 %v1253_v51, %v1237_v55  ;;  %v867_v55 = vsel %vm862_vm10, %v2852_v16, %v2952_v31 }
 0x24d   : > { %1295 = vrot.lane.b32.xlu0 %v1263_v52, %s2330_s22  ;;  %1291 = vrot.lane.b32.xlu1 %v1261_v44, %s2330_s22  ;;  %v1112_v52 = vmul.f32 %v2979_v50, %v2815_v53 }
 0x24e   : > { %1293 = vrot.lane.b32.xlu2 %v1262_v24, %s2330_s22  ;;  %v3164_v37 = vpop.permute.xlu2 %1463 }
 0x24f   : > { %v1140_v51 = vmul.f32 %v3036_v3, %v1112_v52  ;;  %v1361_v52 = vmul.f32 %v1350_v5, %v2765_v6 }
 0x254   : > { %v1346_v1 = vpop.permute.xlu1 %1345 }
 0x255   : > { %1301 = vrot.lane.b32.xlu0 %v1266_v29, %s2330_s22  ;;  %1297 = vrot.lane.b32.xlu1 %v1264_v28, %s2330_s22  ;;  %v1360_v50 = vmul.f32 0.0, %v1346_v1  ;;  %v1359_v22 = vmul.f32 %v1346_v1, %v2738_v36 }
 0x256   : > { %1299 = vrot.lane.b32.xlu2 %v1265_v63, %s2330_s22  ;;  %v1113_v63 = vmul.f32 %v2985_v13, %v2704_v7  ;;  %v3181_v15 = vpop.permute.xlu2 %1337  ;;  %v1358_v13 = vmul.f32 %v1346_v1, %v2720_v11  ;;  %v1363_v1 = vmul.f32 0.0, %v1350_v5 }
 0x258   : > { %v1141_v24 = vmul.f32 %v3036_v3, %v1113_v63  ;;  %v660_v3 = vmul.f32 %v2515_v40, %v2882_v47  ;;  %v984_v40 = vsel %vm979_vm12, %v2872_v20, %v2961_v2  ;;  %v1362_v63 = vmul.f32 %v1350_v5, %v2782_v30 }
 0x259   : > { %v1227_v5 = vmul.f32 %v3135_v38, %v2697_v61 }
 0x25d   : > { %v1245_v44 = vpop.permute.xlu1 %1244  ;;  %1165 = vrot.lane.b32.xlu0 %v1139_v21, %s2329_s19  ;;  %1161 = vrot.lane.b32.xlu1 %v3026_v60, %s2329_s19 }
 0x25e   : > { %1163 = vrot.lane.b32.xlu2 %v3031_v4, %s2329_s19  ;;  %v747_v4 = vsel %vm742_vm11, %v2835_v59, %v2941_v48  ;;  %v3200_v28 = vpop.permute.xlu2 %1459 }
 0x25f   : > { %v769_v59 = vadd.f32 %v747_v4, %v660_v3  ;;  %v1231_v4 = vmul.f32 %v3146_v62, %v2704_v7  ;;  %v2147_v3 = vunpack.i.l.bf16 %v3140_v39 }
 0x261   : > { %v889_v48 = vadd.f32 %v867_v55, %v769_v59  ;;  %v1260_v59 = vmul.f32 %v1245_v44, %v3143_v32 }
 0x263   : > { %v1006_v21 = vadd.f32 %v984_v40, %v889_v48 }
 0x265   : > { %1171 = vrot.lane.b32.xlu0 %v1142_v18, %s2329_s19  ;;  %1167 = vrot.lane.b32.xlu1 %v1140_v51, %s2329_s19  ;;  %v1082_v16 = vadd.f32 %v3097_v46, %v1006_v21  ;;  %v1228_v18 = vmul.f32 %v3146_v62, %v2680_v42  ;;  %v1448_v62 = vmul.f32 %v2147_v3, %v2720_v11 }
 0x266   : > { %1169 = vrot.lane.b32.xlu2 %v1141_v24, %s2329_s19  ;;  %v3186_v60 = vpop.permute.xlu1 %1467  ;;  %v3213_v31 = vpop.permute.xlu2 %1175  ;;  %v1257_v24 = vmul.f32 %v3045_v19, %v3143_v32  ;;  %s1945_s19 = sshll.u32 %s1941_s15, 4  ;;  %s1946_s19 = int_to_ptr.hbm [resolvable:$true] %s1945_s19 }
 0x267   : > { %v1476_v32 = vmul.f32 %v3164_v37, %v1448_v62 }
 0x26d   : > { %1392 = vrot.lane.b32.xlu0 %v1360_v50, %s2331_s23  ;;  %1388 = vrot.lane.b32.xlu1 %v1358_v13, %s2331_s23  ;;  %v1255_v50 = vmul.f32 %v3045_v19, %v1227_v5  ;;  %v1256_v13 = vmul.f32 %v3045_v19, %v1228_v18  ;;  %v1259_v19 = vmul.f32 %v1245_v44, %v1231_v4  ;;  %v1553_v5 = vld [vmem:[%s3791_s4 + $0x10] sm:$0xff] }
 0x26e   : > { %1390 = vrot.lane.b32.xlu2 %v1359_v22, %s2331_s23  ;;  %v3203_v29 = vpop.permute.xlu1 %1455  ;;  %v2148_v22 = vunpack.i.h.bf16 %v3140_v39 }
 0x270   : > { %v3244_v40 = vmul.f32 0.0, %v2148_v22 }
 0x272   : > { %v1481_v21 = vmul.f32 %v3186_v60, %v3244_v40 }
 0x275   : > { %1398 = vrot.lane.b32.xlu0 %v1363_v1, %s2331_s23  ;;  %1394 = vrot.lane.b32.xlu1 %v1361_v52, %s2331_s23  ;;  %v1451_v1 = vmul.f32 %v2147_v3, %v2765_v6  ;;  %v1352_v6 = vmul.f32 %v3181_v15, %v2697_v61 }
 0x276   : > { %1396 = vrot.lane.b32.xlu2 %v1362_v63, %s2331_s23  ;;  %v1174_v51 = vpop.permute.xlu1 %1173  ;;  %v1357_v63 = vmul.f32 0.0, %v3055_v27 }
 0x277   : > { %v1190_v20 = vsel %vm1185_vm1, %v1174_v51, %v3213_v31  ;;  %v3218_v2 = vadd.f32 %v1174_v51, %v1082_v16  ;;  %v1355_v16 = vmul.f32 %v3055_v27, %v2815_v53  ;;  %v1356_v51 = vmul.f32 %v3055_v27, %v2704_v7 }
 0x278   : > { %v3223_v46 = vadd.f32 %v1190_v20, %v3106_v35  ;;  %v1230_v35 = vmul.f32 %v3135_v38, %v2815_v53  ;;  %v3247_v38 = vsel %vm1437_vm2, %v2147_v3, %v2148_v22  ;;  %v1442_v20 = vmul.f32 %v2147_v3, %v2697_v61 }
 0x279   : > { %v1449_v39 = vmul.f32 %v3247_v38, %v2738_v36  ;;  %v1452_v11 = vmul.f32 %v3247_v38, %v2782_v30  ;;  %v1479_v36 = vmul.f32 %v3186_v60, %v1451_v1  ;;  %v1353_v30 = vmul.f32 %v3181_v15, %v2680_v42 }
 0x27a   : > { %v1258_v55 = vmul.f32 %v1245_v44, %v1230_v35  ;;  %v1478_v44 = vmul.f32 %v3164_v37, %v3244_v40  ;;  %v1470_v18 = vmul.f32 %v3203_v29, %v1442_v20  ;;  %v749_v27 = vsel %vm742_vm11, %v2841_v14, %v2967_v54 }
 0x27b   : > { %v1477_v48 = vmul.f32 %v3164_v37, %v1449_v39  ;;  %v1480_v52 = vmul.f32 %v3186_v60, %v1452_v11  ;;  %v1354_v37 = vmul.f32 0.0, %v3181_v15  ;;  %v663_v61 = vmul.f32 %v2520_v43, %v2882_v47 }
 0x27c   : > { %v986_v22 = vsel %vm979_vm12, %v2878_v49, %v2981_v25  ;;  %v1445_v14 = vmul.f32 %v2147_v3, %v2815_v53  ;;  %v1443_v54 = vmul.f32 %v3247_v38, %v2680_v42  ;;  %v1087_v42 = vadd.f32 %v3108_v26, %v3124_v12 }
 0x27d   : > { %1283 = vrot.lane.b32.xlu0 %v1257_v24, %s2330_s22  ;;  %1279 = vrot.lane.b32.xlu1 %v1255_v50, %s2330_s22  ;;  %v1554_v24 = vld [vmem:[%s3791_s4 + $0x18] sm:$0xff]  ;;  %v869_v50 = vsel %vm862_vm10, %v2858_v17, %v2972_v10  ;;  %v772_v35 = vadd.f32 %v749_v27, %v663_v61  ;;  %v1472_v17 = vmul.f32 %v3203_v29, %v3244_v40  ;;  %v3827_v27 = vld [vmem:[#allocation10_spill] sm:$0xff] }
 0x27e   : > { %1281 = vrot.lane.b32.xlu2 %v1256_v13, %s2330_s22  ;;  %v1178_v13 = vpop.permute.xlu0 %1177  ;;  %v1473_v43 = vmul.f32 %v3200_v28, %v1445_v14  ;;  %v1475_v26 = vmul.f32 %v3200_v28, %v3244_v40  ;;  %v1084_v1 = vadd.f32 %v2946_v41, %v3101_v34  ;;  %v1552_v41 = vld [vmem:[%s3791_s4 + $0x8] sm:$0xff]  ;;  %v657_v34 = vmul.f32 %v3060_v23, %v2882_v47 }
 0x27f   : > { %v3826_v23 = vld [vmem:[#allocation7_spill] sm:$0xff] }
 0x285   : > { %1289 = vrot.lane.b32.xlu0 %v1260_v59, %s2330_s22  ;;  %1285 = vrot.lane.b32.xlu1 %v1258_v55, %s2330_s22  ;;  %v892_v55 = vadd.f32 %v869_v50, %v772_v35  ;;  %v1471_v59 = vmul.f32 %v3203_v29, %v1443_v54  ;;  %v1446_v29 = vmul.f32 %v3247_v38, %v2704_v7 }
 0x286   : > { %1287 = vrot.lane.b32.xlu2 %v1259_v19, %s2330_s22  ;;  %s2267_s22 = scalar_lea.hbm %s3794_s7, 32 }
 0x287   : > { %v1009_v19 = vadd.f32 %v986_v22, %v892_v55  ;;  %v1474_v12 = vmul.f32 %v3200_v28, %v1446_v29 }
 0x289   : > { %v1085_v49 = vadd.f32 %v3110_v45, %v1009_v19  ;;  %v1551_v45 = vld [vmem:[%s3791_s4] sm:$0xff] }
 0x28d   : > { %1510 = vrot.lane.b32.xlu0 %v1478_v44, %s2332_s29  ;;  %1506 = vrot.lane.b32.xlu1 %v1476_v32, %s2332_s29 }
 0x28e   : > { %1508 = vrot.lane.b32.xlu2 %v1477_v48, %s2332_s29  ;;  %v1191_v48 = vsel %vm1185_vm1, %v3213_v31, %v1178_v13  ;;  %v3828_v13 = vld [vmem:[#allocation8_spill] sm:$0xff] }
 0x28f   : > { %v1214_v7 = vadd.f32 %v1191_v48, %v1084_v1 }
 0x295   : > { %1516 = vrot.lane.b32.xlu0 %v1481_v21, %s2332_s29  ;;  %1512 = vrot.lane.b32.xlu1 %v1479_v36, %s2332_s29 }
 0x296   : > { %1514 = vrot.lane.b32.xlu2 %v1480_v52, %s2332_s29  ;;  %v3824_v52 = vpack.i.bf16 %v2443_v9, %v2441_v8  ;;  %v865_v8 = vsel %vm862_vm10, %v3826_v23, %v2925_v0  ;;  %v3830_v0 = vld [vmem:[#allocation9_spill] sm:$0xff] }
 0x29d   : > { %1380 = vrot.lane.b32.xlu0 %v1354_v37, %s2331_s23  ;;  %1376 = vrot.lane.b32.xlu1 %v1352_v6, %s2331_s23 }
 0x29e   : > { %1378 = vrot.lane.b32.xlu2 %v1353_v30, %s2331_s23 }
 0x2a0   : > { %v1182_v60 = vpop.permute.xlu2 %1181 }
 0x2a5   : > { %1386 = vrot.lane.b32.xlu0 %v1357_v63, %s2331_s23  ;;  %1382 = vrot.lane.b32.xlu1 %v1355_v16, %s2331_s23  ;;  %v3825_v63 = vld [vmem:[#allocation6_spill] sm:$0xff] }
 0x2a6   : > { %1384 = vrot.lane.b32.xlu2 %v1356_v51, %s2331_s23  ;;  %v745_v16 = vsel %vm742_vm11, %v3825_v63, %v2912_v33  ;;  %v982_v33 = vsel %vm979_vm12, %v3828_v13, %v2931_v56  ;;  %vm1400_vm11 = vcmask 777216   ;;  %s269_s23 = sand.u32 1, %s2301_s25  }
 0x2a7   : > { %v766_v47 = vadd.f32 %v745_v16, %v657_v34  ;;  %s1930_s20 = scalar_lea.sflag [#allocation4], %s269_s23 }
 0x2a8   : > { %v1294_v15 = vpop.permute.xlu2 %1293 }
 0x2a9   : > { %v886_v9 = vadd.f32 %v865_v8, %v766_v47 }
 0x2ab   : > { %v1003_v14 = vadd.f32 %v982_v33, %v886_v9 }
 0x2ad   : > { %1494 = vrot.lane.b32.xlu0 %v1470_v18, %s2332_s29  ;;  %1567 = vperm.xlu1 %2159, %v1553_v5   ;;  %v1079_v54 = vadd.f32 %v3830_v0, %v1003_v14 }
 0x2ae   : > { %1572 = vperm.xlu2 %2160, %v1554_v24  }
 0x2b0   : > { %v1300_v4 = vpop.permute.xlu2 %1299 }
 0x2b5   : > { %1500 = vrot.lane.b32.xlu0 %v1473_v43, %s2332_s29  ;;  %1496 = vrot.lane.b32.xlu1 %v1471_v59, %s2332_s29 }
 0x2b6   : > { %1498 = vrot.lane.b32.xlu2 %v1472_v17, %s2332_s29 }
 0x2b7   : > { %v1184_v53 = vpop.permute.xlu0 %1183  ;;  %v1180_v10 = vpop.permute.xlu1 %1179 }
 0x2b8   : > { %v1193_v25 = vsel %vm1185_vm1, %v1182_v60, %v1184_v53  ;;  %v1192_v3 = vsel %vm1185_vm1, %v1180_v10, %v1182_v60  ;;  %v1215_v62 = vadd.f32 %v1180_v10, %v1085_v49  ;;  %v1164_v39 = vpop.permute.xlu2 %1163  ;;  %v3832_v10 = vld [vmem:[#allocation13_spill] sm:$0xff] }
 0x2b9   : > { %v1217_v32 = vadd.f32 %v1193_v25, %v1087_v42  ;;  %v1216_v44 = vadd.f32 %v1192_v3, %v3129_v58  ;;  %v3831_v42 = vld [vmem:[#allocation12_spill] sm:$0xff] }
 0x2bd   : > { %1557 = vperm.xlu0 %2157, %v1551_v45   ;;  %1502 = vrot.lane.b32.xlu1 %v1474_v12, %s2332_s29 }
 0x2be   : > { %1504 = vrot.lane.b32.xlu2 %v1475_v26, %s2332_s29  ;;  %s2009_s29 = sshll.u32 %s269_s23, 4 }
 0x2bf   : > { %v1296_v58 = vpop.permute.xlu0 %1295  ;;  %v1292_v38 = vpop.permute.xlu1 %1291  ;;  %s271_s9 = scalar_lea.vmem [#allocation3], %s2009_s29 }
 0x2c0   : > { %v1309_v11 = vsel %vm1303_vm3, %v1294_v15, %v1296_v58  ;;  %v1308_v36 = vsel %vm1303_vm3, %v1292_v38, %v1294_v15  ;;  %v1330_v28 = vadd.f32 %v1292_v38, %v3218_v2  ;;  %v1170_v40 = vpop.permute.xlu2 %1169  ;;  %s1943_s17 = sshll.u32 %s271_s9, 4  ;;  %s1944_s17 = int_to_ptr.vmem [resolvable:$true] %s1943_s17 }
 0x2c1   : > { %v1332_v31 = vadd.f32 %v1309_v11, %v1214_v7  ;;  %v1331_v21 = vadd.f32 %v1308_v36, %v3223_v46 }
 0x2c5   : > { %1562 = vperm.xlu1 %2159, %v1552_v41  }
 0x2c6   : > { %2162 = vrot.lane.b32.xlu2 %v3824_v52, %s2313_s16  ;;  %s2261_s16 = sshra.s32 %s1946_s19, 4  ;;  %s2262_s16 = int_to_ptr.hbm [resolvable:$true] %s2261_s16 }
 0x2c7   : > { %v1302_v37 = vpop.permute.xlu0 %1301  ;;  %v1298_v6 = vpop.permute.xlu1 %1297  ;;  %s2263_s28 = scalar_lea.hbm %s2262_s16, 16  ;;  %p2268_p0 = scmp.lt.s32.totalorder %s2262_s16, %s3794_s7 }
 0x2c8   : > { %v1311_v2 = vsel %vm1303_vm3, %v1300_v4, %v1302_v37  ;;  %v1310_v30 = vsel %vm1303_vm3, %v1298_v6, %v1300_v4  ;;  %v1333_v46 = vadd.f32 %v1298_v6, %v1215_v62  ;;  %v1391_v60 = vpop.permute.xlu2 %1390  ;;  %v3829_v4 = vld [vmem:[#allocation11_spill] sm:$0xff]  ;;  %p2264_p11 = scmp.ne.s32.totalorder %s2262_s16, %s2263_s28  ;;  %p2269_p1 = scmp.lt.s32.totalorder %s2267_s22, %s2263_s28 }
 0x2c9   : > { %v1335_v51 = vadd.f32 %v1311_v2, %v1217_v32  ;;  %v1334_v15 = vadd.f32 %v1310_v30, %v1216_v44 }
 0x2ca   : > { %p2265_p12 = pnand %p2264_p11, %p2411_p5  ;;  %p2270_p2 = por %p2269_p1, %p2268_p0 }
 0x2cc   : > { %p2266_p13 = pneg %p2265_p12 }
 0x2ce   : > { %p2271_p3 = pnand %p2270_p2, %p2266_p13 }
 0x2cf   : > { %v1166_v20 = vpop.permute.xlu0 %1165  ;;  %v1162_v5 = vpop.permute.xlu1 %1161 }
 0x2d0   : > { %v1187_v18 = vsel %vm1185_vm1, %v1164_v39, %v1166_v20  ;;  %v1186_v24 = vsel %vm1185_vm1, %v1162_v5, %v1164_v39  ;;  %v1206_v61 = vadd.f32 %v1162_v5, %v3827_v27  ;;  %v1397_v50 = vpop.permute.xlu2 %1396 }
 0x2d1   : > { %v1208_v35 = vadd.f32 %v1187_v18, %v3051_v57  ;;  %v1207_v22 = vadd.f32 %v1186_v24, %v3829_v4 }
 0x2d7   : > { %v1172_v55 = vpop.permute.xlu0 %1171  ;;  %v1168_v43 = vpop.permute.xlu1 %1167 }
 0x2d8   : > { %v1189_v59 = vsel %vm1185_vm1, %v1170_v40, %v1172_v55  ;;  %v1188_v19 = vsel %vm1185_vm1, %v1168_v43, %v1170_v40  ;;  %v3367_v17 = vadd.f32 %v1168_v43, %v1079_v54  ;;  %v1282_v49 = vpop.permute.xlu2 %1281 }
 0x2d9   : > { %v1211_v53 = vadd.f32 %v1189_v59, %v3831_v42  ;;  %v1210_v56 = vadd.f32 %v1188_v19, %v3832_v10 }
 0x2df   : > { %v1393_v57 = vpop.permute.xlu0 %1392  ;;  %v1389_v25 = vpop.permute.xlu1 %1388 }
 0x2e0   : > { %v1406_v3 = vsel %vm1400_vm11, %v1391_v60, %v1393_v57  ;;  %v1405_v62 = vsel %vm1400_vm11, %v1389_v25, %v1391_v60  ;;  %v3373_v39 = vadd.f32 %v1389_v25, %v1330_v28  ;;  %v1288_v29 = vpop.permute.xlu2 %1287 }
 0x2e1   : > { %v3375_v32 = vadd.f32 %v1406_v3, %v1332_v31  ;;  %v3377_v44 = vadd.f32 %v1405_v62, %v1331_v21 }
 0x2e7   : > { %v1399_v45 = vpop.permute.xlu0 %1398  ;;  %v1395_v12 = vpop.permute.xlu1 %1394 }
 0x2e8   : > { %v1408_v26 = vsel %vm1400_vm11, %v1397_v50, %v1399_v45  ;;  %v1407_v48 = vsel %vm1400_vm11, %v1395_v12, %v1397_v50  ;;  %v1509_v1 = vpop.permute.xlu2 %1508 }
 0x2e9   : > { %v1432_v7 = vadd.f32 %v1408_v26, %v1335_v51  ;;  %v1431_v58 = vadd.f32 %v1407_v48, %v1334_v15  ;;  %v1430_v15 = vadd.f32 %v1395_v12, %v1333_v46 }
 0x2ef   : > { %v1284_v38 = vpop.permute.xlu0 %1283  ;;  %v1280_v11 = vpop.permute.xlu1 %1279 }
 0x2f0   : > { %v1305_v36 = vsel %vm1303_vm3, %v1282_v49, %v1284_v38  ;;  %v1304_v28 = vsel %vm1303_vm3, %v1280_v11, %v1282_v49  ;;  %v3383_v40 = vadd.f32 %v1280_v11, %v1206_v61  ;;  %v1515_v31 = vpop.permute.xlu2 %1514 }
 0x2f1   : > { %v3385_v21 = vadd.f32 %v1305_v36, %v1208_v35  ;;  %v3387_v41 = vadd.f32 %v1304_v28, %v1207_v22 }
 0x2f7   : > { %v1290_v34 = vpop.permute.xlu0 %1289  ;;  %v3389_v52 = vpop.permute.xlu1 %1285 }
 0x2f8   : > { %v1307_v37 = vsel %vm1303_vm3, %v1288_v29, %v1290_v34  ;;  %v1306_v6 = vsel %vm1303_vm3, %v3389_v52, %v1288_v29  ;;  %v1379_v2 = vpop.permute.xlu2 %1378  ;;  %v1327_v36 = vadd.f32 %v3389_v52, %v3367_v17 }
 0x2f9   : > { %v3394_v30 = vadd.f32 %v1307_v37, %v1211_v53  ;;  %v3396_v60 = vadd.f32 %v1306_v6, %v1210_v56 }
 0x2ff   : > { %v1511_v63 = vpop.permute.xlu0 %1510  ;;  %v1507_v16 = vpop.permute.xlu1 %1506 }
 0x300   : > { %v3398_v51 = vpop.permute.xlu2 %1384  ;;  %v1524_v56 = vsel %vm1518_vm4, %v1509_v1, %v1511_v63  ;;  %v1523_v57 = vsel %vm1518_vm4, %v1507_v16, %v1509_v1  ;;  %v1545_v25 = vadd.f32 %v1507_v16, %v3373_v39 }
 0x301   : > { %v1547_v62 = vadd.f32 %v1524_v56, %v3375_v32  ;;  %v1546_v29 = vadd.f32 %v1523_v57, %v3377_v44 }
 0x307   : > { %v1517_v47 = vpop.permute.xlu0 %1516  ;;  %v1513_v23 = vpop.permute.xlu1 %1512 }
 0x308   : > { %v1526_v8 = vsel %vm1518_vm4, %v1515_v31, %v1517_v47  ;;  %v1525_v9 = vsel %vm1518_vm4, %v1513_v23, %v1515_v31  ;;  %v1548_v20 = vadd.f32 %v1513_v23, %v1430_v15  ;;  %v1573_v24 = vpop.permute.xlu2 %1572 }
 0x309   : > { %v1550_v5 = vadd.f32 %v1526_v8, %v1432_v7  ;;  %v1549_v18 = vadd.f32 %v1525_v9, %v1431_v58 }
 0x30a   : > { %v3402_v27 = vadd.f32 %v1573_v24, %v1548_v20 }
 0x30b   : > { %v3404_v61 = vadd.f32 %v1573_v24, %v1549_v18  ;;  %v3406_v50 = vadd.f32 %v1573_v24, %v1550_v5 }
 0x30c   : > { %v1596_v13 = vsub.f32 0.0, %v3402_v27 }
 0x30d   : > { %v1597_v46 = vsub.f32 0.0, %v3404_v61  ;;  %v1598_v33 = vsub.f32 0.0, %v3406_v50 }
 0x30e   : > { %v1617_v35 = vmul.f32 1.442695, %v1596_v13 }
 0x30f   : > { %v1619_v4 = vmul.f32 1.442695, %v1597_v46  ;;  %v1621_v22 = vmul.f32 1.442695, %v1598_v33  ;;  %v1381_v14 = vpop.permute.xlu0 %1380  ;;  %v1377_v0 = vpop.permute.xlu1 %1376 }
 0x310   : > { %2198 = vpow2.f32 %v1617_v35  ;;  %v3411_v55 = vpop.permute.xlu2 %1498  ;;  %v1402_v7 = vsel %vm1400_vm11, %v1379_v2, %v1381_v14  ;;  %v1401_v32 = vsel %vm1400_vm11, %v1377_v0, %v1379_v2  ;;  %v1421_v6 = vadd.f32 %v1377_v0, %v3383_v40 }
 0x311   : > { %2200 = vpow2.f32 %v1619_v4  ;;  %v3455_v37 = vadd.f32 %v1402_v7, %v3385_v21  ;;  %v3462_v17 = vadd.f32 %v1401_v32, %v3387_v41 }
 0x312   : > { %2202 = vpow2.f32 %v1621_v22 }
 0x316   : > { %v2199_v54 = vpop.eup %2198 }
 0x317   : > { %v2201_v43 = vpop.eup %2200  ;;  %v3413_v59 = vadd.f32 1.0, %v2199_v54  ;;  %v1387_v19 = vpop.permute.xlu0 %1386 }
 0x318   : > { %v1383_v49 = vpop.permute.xlu1 %1382  ;;  %v2203_v42 = vpop.eup %2202  ;;  %v3415_v53 = vadd.f32 1.0, %v2201_v43  ;;  %v1404_v40 = vsel %vm1400_vm11, %v3398_v51, %v1387_v19 }
 0x319   : > { %v3417_v10 = vadd.f32 1.0, %v2203_v42  ;;  %2204 = vrcp.f32 %v3413_v59  ;;  %v3443_v44 = vpop.permute.xlu2 %1504  ;;  %v1779_v16 = vand.u32 2147483647, %v3413_v59  ;;  %v1781_v21 = vand.u32 2147483648, %v3413_v59 }
 0x31a   : > { %2206 = vrcp.f32 %v3415_v53  ;;  %v1403_v20 = vsel %vm1400_vm11, %v1383_v49, %v3398_v51  ;;  %v1796_v5 = vand.u32 2147483648, %v3415_v53  ;;  %v1424_v18 = vadd.f32 %v1383_v49, %v1327_v36 }
 0x31b   : > { %2208 = vrcp.f32 %v3417_v10  ;;  %vm1775_vm5 = vweird.f32 %v3413_v59  ;;  %vm1790_vm6 = vweird.f32 %v3415_v53  ;;  %v1794_v46 = vand.u32 2147483647, %v3415_v53 }
 0x31c   : > { %vm3479_vm8 = vcmp.eq.f32.partialorder %v1779_v16, 8.507059e+37  ;;  %v1782_v22 = vor.u32 1.1754944e-38, %v1781_v21  ;;  %vm1805_vm9 = vweird.f32 %v3417_v10  ;;  %v1809_v14 = vand.u32 2147483647, %v3417_v10 }
 0x31d   : > { %v1811_v0 = vand.u32 2147483648, %v3417_v10  ;;  %v3487_v54 = vor.u32 1.1754944e-38, %v1796_v5  ;;  %v1426_v56 = vadd.f32 %v1404_v40, %v3394_v30  ;;  %v1425_v57 = vadd.f32 %v1403_v20, %v3396_v60 }
 0x31e   : > { %vm3523_vm1 = vcmp.eq.f32.partialorder %v1809_v14, 8.507059e+37 }
 0x31f   : > { %v3425_v3 = vpop.eup %2204  ;;  %v3429_v45 = vpop.permute.xlu0 %1494 }
 0x320   : > { %v1568_v12 = vpop.permute.xlu1 %1567  ;;  %v3431_v26 = vpop.eup %2206  ;;  %v1771_v48 = vmul.f32 %v3425_v3, %v3413_v59  ;;  %vm1776_vm7 = vweird.f32 %v3425_v3 }
 0x321   : > { %v3436_v58 = vadd.f32 %v1568_v12, %v1545_v25  ;;  %v3438_v1 = vpop.eup %2208  ;;  %v1786_v39 = vmul.f32 %v3431_v26, %v3415_v53  ;;  %v3445_v38 = vadd.f32 %v1568_v12, %v1546_v29  ;;  %v3447_v11 = vadd.f32 %v1568_v12, %v1547_v62  ;;  %v2163_v4 = vpop.permute.xlu2 %2162  ;;  %vm3493_vm12 = vmor %vm1775_vm5, %vm1776_vm7 }
 0x322   : > { %v1772_v28 = vsub.f32 1.0, %v1771_v48  ;;  %v1801_v31 = vmul.f32 %v3438_v1, %v3417_v10  ;;  %vm1806_vm10 = vweird.f32 %v3438_v1  ;;  %v2165_v19 = vunpack.i.h.bf16 %v2163_v4 }
 0x323   : > { %v1593_v34 = vsub.f32 0.0, %v3436_v58  ;;  %v1594_v2 = vsub.f32 0.0, %v3445_v38  ;;  %v1595_v63 = vsub.f32 0.0, %v3447_v11  ;;  %v1787_v23 = vsub.f32 1.0, %v1786_v39  ;;  %vm3510_vm15 = vmor %vm1805_vm9, %vm1806_vm10 }
 0x324   : > { %v1802_v15 = vsub.f32 1.0, %v1801_v31  ;;  %v1773_v47 = vmul.f32 %v3425_v3, %v1772_v28  ;;  %vm1791_vm13 = vweird.f32 %v3431_v26  ;;  %v2164_v25 = vunpack.i.l.bf16 %v2163_v4 }
 0x325   : > { %v1611_v52 = vmul.f32 1.442695, %v1593_v34  ;;  %v1613_v8 = vmul.f32 1.442695, %v1594_v2  ;;  %v1615_v9 = vmul.f32 1.442695, %v1595_v63  ;;  %v1788_v35 = vmul.f32 %v3431_v26, %v1787_v23  ;;  %vm3543_vm3 = vmor %vm1790_vm6, %vm1791_vm13 }
 0x326   : > { %v1803_v41 = vmul.f32 %v3438_v1, %v1802_v15  ;;  %v1774_v33 = vadd.f32 %v3425_v3, %v1773_v47  ;;  %v1845_v48 = vpack.c.bf16 %v2165_v19, %v2165_v19  ;;  %v1843_v32 = vpack.c.bf16 %v2164_v25, %v2164_v25 }
 0x327   : > { %2210 = vpow2.f32 %v1611_v52  ;;  %v3472_v24 = vpop.permute.xlu0 %1500  ;;  %v3504_v12 = vadd.f32 %v3431_v26, %v1788_v35  ;;  %v1812_v34 = vor.u32 1.1754944e-38, %v1811_v0  ;;  %v1539_v2 = vadd.f32 %v3429_v45, %v1421_v6 }
 0x328   : > { %2212 = vpow2.f32 %v1613_v8  ;;  %v1497_v13 = vpop.permute.xlu1 %1496  ;;  %v1804_v43 = vadd.f32 %v3438_v1, %v1803_v41  ;;  %v1778_v29 = vsel %vm3493_vm12, %v3425_v3, %v1774_v33  ;;  %1878 = vrot.lane.b32.xlu0 %v1845_v48, %s2327_s18  ;;  %1874 = vrot.lane.b32.xlu1 %v1843_v32, %s2327_s18 }
 0x329   : > { %2214 = vpow2.f32 %v1615_v9  ;;  %v1519_v60 = vsel %vm1518_vm4, %v3429_v45, %v1497_v13  ;;  %v1520_v3 = vsel %vm1518_vm4, %v1497_v13, %v3411_v55  ;;  %v1542_v55 = vadd.f32 %v3472_v24, %v1424_v18 }
 0x32a   : > { %v1808_v36 = vsel %vm3510_vm15, %v3438_v1, %v1804_v43  ;;  %v3537_v1 = vsel %vm3479_vm8, %v1782_v22, %v1778_v29  ;;  %v1540_v45 = vadd.f32 %v1519_v60, %v3462_v17  ;;  %v1541_v6 = vadd.f32 %v1520_v3, %v3455_v37 }
 0x32b   : > { %v1793_v15 = vsel %vm3543_vm3, %v3431_v26, %v3504_v12  ;;  %v3556_v52 = vsel %vm3523_vm1, %v1812_v34, %v1808_v36  ;;  %vm1795_vm1 = vcmp.eq.f32.partialorder %v1794_v46, 8.507059e+37  ;;  %v1824_v53 = vmul.f32 %v3537_v1, %v3402_v27 }
 0x32d   : > { %v2211_v49 = vpop.eup %2210 }
 0x32e   : > { %v2213_v62 = vpop.eup %2212  ;;  %v3506_v59 = vadd.f32 1.0, %v2211_v49 }
 0x32f   : > { %v2215_v7 = vpop.eup %2214  ;;  %v3514_v30 = vadd.f32 1.0, %v2213_v62  ;;  %v1558_v63 = vpop.permute.xlu0 %1557 }
 0x330   : > { %v3527_v10 = vadd.f32 1.0, %v2215_v7  ;;  %2216 = vrcp.f32 %v3506_v59  ;;  %v1503_v31 = vpop.permute.xlu1 %1502  ;;  %v1734_v47 = vand.u32 2147483647, %v3506_v59  ;;  %v1736_v23 = vand.u32 2147483648, %v3506_v59 }
 0x331   : > { %2218 = vrcp.f32 %v3514_v30  ;;  %v1749_v8 = vand.u32 2147483647, %v3514_v30  ;;  %v3561_v9 = vadd.f32 %v1558_v63, %v1539_v2  ;;  %v3563_v17 = vadd.f32 %v1558_v63, %v1540_v45 }
 0x332   : > { %2220 = vrcp.f32 %v3527_v10  ;;  %v3565_v37 = vadd.f32 %v1558_v63, %v1541_v6  ;;  %vm1730_vm11 = vweird.f32 %v3506_v59  ;;  %v1751_v21 = vand.u32 2147483648, %v3514_v30 }
 0x333   : > { %v1764_v40 = vand.u32 2147483647, %v3527_v10  ;;  %v1521_v20 = vsel %vm1518_vm4, %v3472_v24, %v1503_v31  ;;  %v1522_v5 = vsel %vm1518_vm4, %v1503_v31, %v3443_v44  ;;  %vm1745_vm5 = vweird.f32 %v3514_v30 }
 0x334   : > { %v1766_v18 = vand.u32 2147483648, %v3527_v10  ;;  %v1587_v13 = vsub.f32 0.0, %v3561_v9  ;;  %v1588_v33 = vsub.f32 0.0, %v3563_v17  ;;  %v1589_v51 = vsub.f32 0.0, %v3565_v37 }
 0x335   : > { %v1543_v22 = vadd.f32 %v1521_v20, %v1425_v57  ;;  %v1833_v24 = vsel %vm617_vm14, %v2164_v25, %v2165_v19  ;;  %vm3581_vm4 = vcmp.eq.f32.partialorder %v1734_v47, 8.507059e+37  ;;  %v1544_v42 = vadd.f32 %v1522_v5, %v1426_v56 }
 0x336   : > { %v2217_v41 = vpop.eup %2216  ;;  %v1599_v43 = vmul.f32 1.442695, %v1587_v13  ;;  %v1601_v49 = vmul.f32 1.442695, %v1588_v33  ;;  %v1603_v7 = vmul.f32 1.442695, %v1589_v51  ;;  %v1844_v57 = vpack.c.bf16 %v1833_v24, %v1833_v24 }
 0x337   : > { %v2219_v35 = vpop.eup %2218  ;;  %v1726_v4 = vmul.f32 %v2217_v41, %v3506_v59  ;;  %vm1731_vm6 = vweird.f32 %v2217_v41  ;;  %vm1760_vm9 = vweird.f32 %v3527_v10  ;;  %v1767_v33 = vor.u32 1.1754944e-38, %v1766_v18 }
 0x338   : > { %v2221_v14 = vpop.eup %2220  ;;  %v1741_v0 = vmul.f32 %v2219_v35, %v3514_v30  ;;  %v1563_v62 = vpop.permute.xlu1 %1562  ;;  %vm1746_vm7 = vweird.f32 %v2219_v35  ;;  %2222 = vpow2.f32 %v1599_v43  ;;  %1876 = vrot.lane.b32.xlu2 %v1844_v57, %s2327_s18  ;;  %vm3599_vm8 = vmor %vm1730_vm11, %vm1731_vm6  ;;  %vm1765_vm13 = vcmp.eq.f32.partialorder %v1764_v40, 8.507059e+37 }
 0x339   : > { %v1727_v29 = vsub.f32 1.0, %v1726_v4  ;;  %v1756_v48 = vmul.f32 %v2221_v14, %v3527_v10  ;;  %v3587_v19 = vadd.f32 %v1563_v62, %v1542_v55  ;;  %2224 = vpow2.f32 %v1601_v49  ;;  %vm3609_vm10 = vmor %vm1745_vm5, %vm1746_vm7 }
 0x33a   : > { %v1742_v39 = vsub.f32 1.0, %v1741_v0  ;;  %v3589_v3 = vadd.f32 %v1563_v62, %v1543_v22  ;;  %2226 = vpow2.f32 %v1603_v7  ;;  %v3591_v36 = vadd.f32 %v1563_v62, %v1544_v42 }
 0x33b   : > { %v1728_v25 = vmul.f32 %v2217_v41, %v1727_v29  ;;  %v1757_v60 = vsub.f32 1.0, %v1756_v48  ;;  %v1590_v56 = vsub.f32 0.0, %v3587_v19  ;;  %vm1761_vm14 = vweird.f32 %v2221_v14 }
 0x33c   : > { %v1743_v32 = vmul.f32 %v2219_v35, %v1742_v39  ;;  %v1591_v34 = vsub.f32 0.0, %v3589_v3  ;;  %v1737_v55 = vor.u32 1.1754944e-38, %v1736_v23  ;;  %v1592_v20 = vsub.f32 0.0, %v3591_v36  ;;  %vm1762_vm12 = vmor %vm1760_vm9, %vm1761_vm14 }
 0x33d   : > { %v1729_v28 = vadd.f32 %v2217_v41, %v1728_v25  ;;  %v1758_v31 = vmul.f32 %v2221_v14, %v1757_v60  ;;  %v1605_v45 = vmul.f32 1.442695, %v1590_v56  ;;  %v1752_v10 = vor.u32 1.1754944e-38, %v1751_v21 }
 0x33e   : > { %v1744_v63 = vadd.f32 %v2219_v35, %v1743_v32  ;;  %v1607_v5 = vmul.f32 1.442695, %v1591_v34  ;;  %v2223_v13 = vpop.eup %2222  ;;  %vm1750_vm15 = vcmp.eq.f32.partialorder %v1749_v8, 8.507059e+37  ;;  %v1609_v18 = vmul.f32 1.442695, %v1592_v20 }
 0x33f   : > { %v1733_v6 = vsel %vm3599_vm8, %v2217_v41, %v1729_v28  ;;  %v1759_v59 = vadd.f32 %v2221_v14, %v1758_v31  ;;  %2228 = vpow2.f32 %v1605_v45  ;;  %v2225_v41 = vpop.eup %2224  ;;  %v3619_v22 = vadd.f32 1.0, %v2223_v13 }
 0x340   : > { %v1748_v23 = vsel %vm3609_vm10, %v2219_v35, %v1744_v63  ;;  %v1738_v51 = vsel %vm3581_vm4, %v1737_v55, %v1733_v6  ;;  %v2227_v24 = vpop.eup %2226  ;;  %v3623_v43 = vadd.f32 1.0, %v2225_v41  ;;  %2230 = vpow2.f32 %v1607_v5 }
 0x341   : > { %v1763_v4 = vsel %vm1762_vm12, %v2221_v14, %v1759_v59  ;;  %v1753_v21 = vsel %vm1750_vm15, %v1752_v10, %v1748_v23  ;;  %v3625_v35 = vadd.f32 1.0, %v2227_v24  ;;  %2232 = vrcp.f32 %v3619_v22 }
 0x342   : > { %v1768_v0 = vsel %vm1765_vm13, %v1767_v33, %v1763_v4  ;;  %v1821_v40 = vmul.f32 %v1738_v51, %v3436_v58  ;;  %2234 = vrcp.f32 %v3623_v43  ;;  %v1798_v30 = vsel %vm1795_vm1, %v3487_v54, %v1793_v15 }
 0x343   : > { %v1823_v14 = vmul.f32 %v1768_v0, %v3447_v11  ;;  %2236 = vrcp.f32 %v3625_v35  ;;  %v1826_v58 = vmul.f32 %v3556_v52, %v3406_v50  ;;  %v1822_v11 = vmul.f32 %v1753_v21, %v3445_v38 }
 0x344   : > { %2238 = vpow2.f32 %v1609_v18  ;;  %v1825_v44 = vmul.f32 %v1798_v30, %v3404_v61  ;;  %v1840_v12 = vpack.c.bf16 %v1824_v53, %v1821_v40  ;;  %v1644_v52 = vand.u32 2147483647, %v3619_v22 }
 0x345   : > { %v2229_v8 = vpop.eup %2228  ;;  %v1842_v26 = vpack.c.bf16 %v1826_v58, %v1823_v14  ;;  %v1646_v29 = vand.u32 2147483648, %v3619_v22  ;;  %vm1640_vm3 = vweird.f32 %v3619_v22  ;;  %vm1655_vm11 = vweird.f32 %v3623_v43 }
 0x346   : > { %v3645_v46 = vadd.f32 1.0, %v2229_v8  ;;  %v2231_v16 = vpop.eup %2230  ;;  %1868 = vrot.lane.b32.xlu1 %v1840_v12, %s2327_s18  ;;  %v1841_v50 = vpack.c.bf16 %v1825_v44, %v1822_v11  ;;  %v1659_v32 = vand.u32 2147483647, %v3623_v43  ;;  %v1661_v56 = vand.u32 2147483648, %v3623_v43 }
 0x347   : > { %v2233_v54 = vpop.eup %2232  ;;  %v3648_v15 = vadd.f32 1.0, %v2231_v16  ;;  %1872 = vrot.lane.b32.xlu0 %v1842_v26, %s2327_s18  ;;  %vm3673_vm6 = vcmp.eq.f32.partialorder %v1644_v52, 8.507059e+37  ;;  %vm1670_vm4 = vweird.f32 %v3625_v35  ;;  %v1647_v55 = vor.u32 1.1754944e-38, %v1646_v29 }
 0x348   : > { %2240 = vrcp.f32 %v3645_v46  ;;  %v3651_v49 = vpop.eup %2234  ;;  %v1636_v27 = vmul.f32 %v2233_v54, %v3619_v22  ;;  %1870 = vrot.lane.b32.xlu2 %v1841_v50, %s2327_s18  ;;  %vm1641_vm5 = vweird.f32 %v2233_v54  ;;  %v1674_v63 = vand.u32 2147483647, %v3625_v35 }
 0x349   : > { %v3656_v38 = vpop.eup %2236  ;;  %v1651_v61 = vmul.f32 %v3651_v49, %v3623_v43  ;;  %2242 = vrcp.f32 %v3648_v15  ;;  %v1676_v45 = vand.u32 2147483648, %v3625_v35  ;;  %v1691_v59 = vand.u32 2147483648, %v3645_v46  ;;  %vm3687_vm7 = vmor %vm1640_vm3, %vm1641_vm5 }
 0x34a   : > { %v1637_v1 = vsub.f32 1.0, %v1636_v27  ;;  %v1666_v42 = vmul.f32 %v3656_v38, %v3625_v35  ;;  %v2239_v62 = vpop.eup %2238  ;;  %vm1656_vm14 = vweird.f32 %v3651_v49  ;;  %vm3693_vm8 = vcmp.eq.f32.partialorder %v1659_v32, 8.507059e+37 }
 0x34b   : > { %v1652_v48 = vsub.f32 1.0, %v1651_v61  ;;  %v3667_v57 = vadd.f32 1.0, %v2239_v62  ;;  %v1662_v10 = vor.u32 1.1754944e-38, %v1661_v56  ;;  %v1689_v51 = vand.u32 2147483647, %v3645_v46  ;;  %vm3705_vm12 = vmor %vm1655_vm11, %vm1656_vm14 }
 0x34c   : > { %v1638_v7 = vmul.f32 %v2233_v54, %v1637_v1  ;;  %v1667_v39 = vsub.f32 1.0, %v1666_v42  ;;  %vm1685_vm10 = vweird.f32 %v3645_v46  ;;  %v1704_v22 = vand.u32 2147483647, %v3648_v15 }
 0x34d   : > { %v1653_v60 = vmul.f32 %v3651_v49, %v1652_v48  ;;  %2244 = vrcp.f32 %v3667_v57  ;;  %v1706_v24 = vand.u32 2147483648, %v3648_v15  ;;  %vm1671_vm13 = vweird.f32 %v3656_v38 }
 0x34e   : > { %v2241_v25 = vpop.eup %2240  ;;  %v1639_v28 = vadd.f32 %v2233_v54, %v1638_v7  ;;  %v1668_v6 = vmul.f32 %v3656_v38, %v1667_v39  ;;  %v1692_v40 = vor.u32 1.1754944e-38, %v1691_v59  ;;  %vm1690_vm3 = vcmp.eq.f32.partialorder %v1689_v51, 8.507059e+37  ;;  %vm3720_vm5 = vmor %vm1670_vm4, %vm1671_vm13 }
 0x34f   : > { %v1681_v34 = vmul.f32 %v2241_v25, %v3645_v46  ;;  %v2243_v2 = vpop.eup %2242  ;;  %v1654_v13 = vadd.f32 %v3651_v49, %v1653_v60  ;;  %vm1686_vm9 = vweird.f32 %v2241_v25  ;;  %vm1700_vm11 = vweird.f32 %v3648_v15 }
 0x350   : > { %v1696_v20 = vmul.f32 %v2243_v2, %v3648_v15  ;;  %v1643_v33 = vsel %vm3687_vm7, %v2233_v54, %v1639_v28  ;;  %v1669_v21 = vadd.f32 %v3656_v38, %v1668_v6  ;;  %vm1687_vm15 = vmor %vm1685_vm10, %vm1686_vm9  ;;  %vm1701_vm1 = vweird.f32 %v2243_v2 }
 0x351   : > { %v1682_v47 = vsub.f32 1.0, %v1681_v34  ;;  %v1648_v30 = vsel %vm3673_vm6, %v1647_v55, %v1643_v33  ;;  %v1658_v8 = vsel %vm3705_vm12, %v3651_v49, %v1654_v13  ;;  %vm1705_vm6 = vcmp.eq.f32.partialorder %v1704_v22, 8.507059e+37  ;;  %vm1702_vm7 = vmor %vm1700_vm11, %vm1701_vm1 }
 0x352   : > { %v1697_v4 = vsub.f32 1.0, %v1696_v20  ;;  %v1707_v44 = vor.u32 1.1754944e-38, %v1706_v24  ;;  %v1663_v26 = vsel %vm3693_vm8, %v1662_v10, %v1658_v8  ;;  %v1815_v12 = vmul.f32 %v1648_v30, %v3561_v9  ;;  %v1846_v20 = vld [vmem:[%s3792_s5] sm:$0xf] }
 0x353   : > { %v1683_v41 = vmul.f32 %v2241_v25, %v1682_v47  ;;  %v2245_v14 = vpop.eup %2244  ;;  %v1673_v35 = vsel %vm3720_vm5, %v3656_v38, %v1669_v21  ;;  %v1719_v27 = vand.u32 2147483647, %v3667_v57  ;;  %v1721_v50 = vand.u32 2147483648, %v3667_v57 }
 0x354   : > { %v1698_v43 = vmul.f32 %v2243_v2, %v1697_v4  ;;  %v1711_v58 = vmul.f32 %v2245_v14, %v3667_v57  ;;  %vm1716_vm4 = vweird.f32 %v2245_v14  ;;  %v1677_v42 = vor.u32 1.1754944e-38, %v1676_v45 }
 0x355   : > { %v1684_v18 = vadd.f32 %v2241_v25, %v1683_v41  ;;  %v1816_v9 = vmul.f32 %v1663_v26, %v3563_v17  ;;  %vm1675_vm14 = vcmp.eq.f32.partialorder %v1674_v63, 8.507059e+37  ;;  %vm1715_vm8 = vweird.f32 %v3667_v57 }
 0x356   : > { %v1699_v16 = vadd.f32 %v2243_v2, %v1698_v43  ;;  %v1712_v54 = vsub.f32 1.0, %v1711_v58  ;;  %v1678_v38 = vsel %vm1675_vm14, %v1677_v42, %v1673_v35  ;;  %vm1717_vm9 = vmor %vm1715_vm8, %vm1716_vm4  ;;  %v1722_v29 = vor.u32 1.1754944e-38, %v1721_v50 }
 0x357   : > { %v1688_v53 = vsel %vm1687_vm15, %v2241_v25, %v1684_v18  ;;  %vm1720_vm10 = vcmp.eq.f32.partialorder %v1719_v27, 8.507059e+37  ;;  %v1817_v25 = vmul.f32 %v1678_v38, %v3565_v37 }
 0x358   : > { %v1693_v46 = vsel %vm1690_vm3, %v1692_v40, %v1688_v53  ;;  %v1703_v49 = vsel %vm1702_vm7, %v2243_v2, %v1699_v16  ;;  %v1713_v1 = vmul.f32 %v2245_v14, %v1712_v54 }
 0x359   : > { %v1818_v15 = vmul.f32 %v1693_v46, %v3587_v19  ;;  %v1708_v61 = vsel %vm1705_vm6, %v1707_v44, %v1703_v49 }
 0x35a   : > { %v1819_v62 = vmul.f32 %v1708_v61, %v3589_v3  ;;  %v1714_v19 = vadd.f32 %v2245_v14, %v1713_v1  ;;  %v1847_v3 = vld [vmem:[%s3793_s6] sm:$0xff] }
 0x35b   : > { %v1837_v52 = vpack.c.bf16 %v1818_v15, %v1815_v12 }
 0x35c   : > { %v1838_v48 = vpack.c.bf16 %v1819_v62, %v1816_v9  ;;  %v1718_v7 = vsel %vm1717_vm9, %v2245_v14, %v1714_v19 }
 0x35d   : > { %1862 = vrot.lane.b32.xlu1 %v1837_v52, %s2327_s18  ;;  %v1723_v39 = vsel %vm1720_vm10, %v1722_v29, %v1718_v7 }
 0x35e   : > { %1864 = vrot.lane.b32.xlu2 %v1838_v48, %s2327_s18  ;;  %v1820_v17 = vmul.f32 %v1723_v39, %v3591_v36 }
 0x360   : > { %v1839_v57 = vpack.c.bf16 %v1820_v17, %v1817_v25 }
 0x362   : > { %1866 = vrot.lane.b32.xlu0 %v1839_v57, %s2327_s18 }
 0x365   : > { %1850 = vperm.xlu1 %2159, %v1847_v3  }
 0x392   : > { %v1877_v60 = vpop.permute.xlu2 %1876 }
 0x39a   : > { %v1879_v32 = vpop.permute.xlu0 %1878  ;;  %v1875_v56 = vpop.permute.xlu1 %1874 }
 0x39b   : > { %v1886_v28 = vsel %vm1437_vm2, %v1877_v60, %v1879_v32  ;;  %v1885_v31 = vsel %vm1437_vm2, %v1875_v56, %v1877_v60 }
 0x39c   : > { %v1899_v34 = vsel %vm327_vm0, %v1886_v28, 0  ;;  %v1896_v37 = vsel %vm327_vm0, %v1885_v31, 0  ;;  %vm1891_vm0 = vcmask 326656  }
 0x39d   : > { %1919 = vmatpush.bf16.msra.mxu3 %v1899_v34  ;;  %1906 = vmatpush.bf16.msra.mxu2 %v1896_v37 }
 0x3a2   : > { %v1871_v36 = vpop.permute.xlu2 %1870 }
 0x3b8   : > { %v1869_v55 = vpop.permute.xlu1 %1868  ;;  %v1865_v6 = vpop.permute.xlu2 %1864 }
 0x3b9   : > { %v1873_v2 = vpop.permute.xlu0 %1872  ;;  %v1883_v63 = vsel %vm1437_vm2, %v1869_v55, %v1871_v36 }
 0x3ba   : > { %v1884_v45 = vsel %vm1437_vm2, %v1871_v36, %v1873_v2  ;;  %1907 = vmatpush.bf16.msra.mxu2 %v1883_v63 }
 0x3bb   : > { %1920 = vmatpush.bf16.msra.mxu3 %v1884_v45 }
 0x3cf   : > { %v1863_v47 = vpop.permute.xlu1 %1862 }
 0x3d0   : > { %v1881_v59 = vsel %vm1437_vm2, %v1863_v47, %v1865_v6 }
 0x3d1   : > { %1908 = vmatpush.bf16.msra.mxu2 %v1881_v59 }
 0x3d4   : > { %2028 = vmatmul.msk.bf16.vlgmr.msra.gmra.mxu2 %vm1891_vm0, %v1846_v20  ;;  %v1867_v5 = vpop.permute.xlu0 %1866 }
 0x3d5   : > { %v1882_v13 = vsel %vm1437_vm2, %v1865_v6, %v1867_v5 }
 0x3d6   : > { %1921 = vmatpush.bf16.msra.mxu3 %v1882_v13 }
 0x3d7   : > { %v1851_v23 = vpop.permute.xlu1 %1850 }
 0x3d9   : > { %2029 = vmatmul.msk.bf16.vlgmr.msra.gmra.mxu3 %vm1891_vm0, %v1846_v20 }
 0x457   : > { %v1910_v10 = vpop.f32.mrf.mxu2 }
 0x458   : > { %v1911_v33 = vadd.f32 %v1910_v10, %v1851_v23 }
 0x45a   : > { %1927 = vst [vmem:[%s271_s9] sm:$0xff] %v1911_v33 }
 0x45c   : > { %v1923_v41 = vpop.f32.mrf.mxu3 }
 0x45d   : > { %v1924_v4 = vadd.f32 %v1923_v41, %v1851_v23 }
 0x45f   : > { %v1912_v51 = vpop.f32.mrf.mxu2  ;;  %1928 = vst [vmem:[%s271_s9 + $0x8] sm:$0xff] %v1924_v4 }
 0x460   : > { %2274 = shalt.err (!%p2271_p3)
}
 0x461   : > { %2039 = dma.vmem_to_hbm [thread:$0]  (%p2411_p5), %s1944_s17, 256, %s1946_s19, %s1930_s20  }
 0x464   : > { %v1925_v22 = vpop.f32.mrf.mxu3 }
 0x465 PF: > { %p2045_p4 = scmp.ge.s32.totalorder %s2309_s27, 2  ;;  %s1957_s23 = sand.u32 1, %s2297_s24  }
 0x466   : > { %s1958_s9 = scalar_lea.sflag [#allocation4], %s1957_s23 }
 0x467   : > { %p2042_p7 = pnand %p2045_p4, %p2415_p6 }
 0x469   : > { %p2043_p8 = pneg %p2042_p7 }
 0x46b   : > { %2292 = dma.done.wait (%p2043_p8), %s1958_s9, 256  }
 0x46c   : > { %2294 = vsyncadd (%p2043_p8), %s1958_s9, 4294967040  ;;  %p17_p9 = scmp.ge.s32.totalorder %s2398_s30, 4   ;;  %s3859_s24 = smov %s2301_s25 }
 0x46d   : > { %s3860_s25 = smov %s2305_s26  ;;  %s3861_s26 = smov %s2409_s10 }
 0x46e   : > { %s3862_s27 = smov %s2398_s30  ;;  %19 = sbr.rel (!%p17_p9) target bundleno = 3 (0x3), region = 83 }
 0x473   :  { %1964 = vsyncpa [#allocation4], 1 }
 0x474   :  { %1966 = vsyncpa [#allocation4 + $0x1], 1 }

</bundles_post_ra>
